<compile_context>
chip_gen: v7x
topology: tpu7x:2x2x1
jax: 0.10.0
libtpu: 0.0.40
codegen_flags: <defaults>
</compile_context>

<pallas_src>
import functools

import jax
import jax.numpy as jnp
from jax.experimental import pallas as pl
from jax.experimental.pallas import tpu as pltpu

BN_EPS = 1e-5


def _round_up(x, m):
    return (x + m - 1) // m * m


def _conv_tile_t(x_ref, w_ref, m_idx, *, taps, wp, bm, bm_ext):
    """Transposed conv tile: (co_pad, bm) f32 for output tile `m_idx`.

    x_ref: (1, s_req, cin_pad) bf16 -- one spatially-padded image, flattened
           with row stride wp (plus a zero tail so every window read is in
           range).
    w_ref: (kh*kw, co_pad, cin_pad) bf16 -- per-tap weight matrices.

    One aligned halo'd window is loaded per tile; each tap is a static
    (unaligned) sub-slice of that window feeding a bf16 MXU matmul contracted
    over Cin, accumulated in f32.
    """
    start = pl.multiple_of(m_idx * bm, bm)
    win = x_ref[0, pl.ds(start, bm_ext), :]                 # (bm_ext, cin_pad)
    acc = None
    for t, (i, j) in enumerate(taps):
        off = i * wp + j                                    # static offset
        xt = win[off:off + bm]                              # (bm, cin_pad)
        part = jax.lax.dot_general(
            w_ref[t], xt, (((1,), (1,)), ((), ())),
            preferred_element_type=jnp.float32)             # (co_pad, bm)
        acc = part if acc is None else acc + part
    return acc


def _stats_kernel(x_ref, w_ref, mask_ref, sum_ref, sq_ref, *,
                  taps, wp, bm, bm_ext):
    """Pass 1: per-image, per-channel sum / sum-of-squares of the conv.

    sum_ref/sq_ref: (1, co_pad, 1) f32 blocks keyed on the (parallel) batch
    axis and revisited across the (arbitrary) M axis.  mask_ref zeroes the
    kw-1 wrap-around columns per output row and the padded tail so they do not
    pollute the batch statistics.
    """
    m = pl.program_id(1)

    @pl.when(m == 0)
    def _():
        sum_ref[...] = jnp.zeros_like(sum_ref)
        sq_ref[...] = jnp.zeros_like(sq_ref)

    conv = _conv_tile_t(x_ref, w_ref, m, taps=taps, wp=wp, bm=bm, bm_ext=bm_ext)
    conv = conv * mask_ref[...]                             # (co_pad, bm)
    sum_ref[...] += jnp.sum(conv, axis=-1, keepdims=True)[None]
    sq_ref[...] += jnp.sum(conv * conv, axis=-1, keepdims=True)[None]


def _apply_kernel(x_ref, w_ref, s_ref, t_ref, o_ref, *, taps, wp, bm, bm_ext):
    """Pass 2: recompute the conv tile and apply folded BN + ReLU (one FMA)."""
    m = pl.program_id(1)
    conv = _conv_tile_t(x_ref, w_ref, m, taps=taps, wp=wp, bm=bm, bm_ext=bm_ext)
    y = conv * s_ref[...] + t_ref[...]                      # (co_pad, bm) f32
    o_ref[...] = jnp.maximum(y, 0.0)[None].astype(o_ref.dtype)


@functools.partial(
    jax.jit,
    static_argnames=("kh", "kw", "pad", "block_m", "vmem_limit_bytes"))
def basic_conv2d(x, weight, bias, gamma, beta, *, kh, kw, pad,
                 block_m=512, vmem_limit_bytes=None):
    """x: (N, Cin, H, W) NCHW.  weight: (Cout, Cin, kh, kw).  Returns NCHW.

    block_m: output positions per grid step (rounded to a multiple of 128).
      v5e/v6e (128 MiB VMEM): 1024-2048 is fine (optionally raise
      vmem_limit_bytes to ~64-96 MiB); v7x (64 MiB VMEM): keep 512-1024.
    Stride is fixed at 1; padding is symmetric `pad` on both spatial dims.
    """
    n, cin, h, w = x.shape
    cout = weight.shape[0]
    # Training-mode BN subtracts the per-channel batch mean, so the conv bias
    # cancels exactly; it is folded out of both kernels.  (Eval-mode BN would
    # need it back.)
    del bias

    h_out = h + 2 * pad - kh + 1
    w_out = w + 2 * pad - kw + 1
    hp, wp = h + 2 * pad, w + 2 * pad
    m_img = h_out * wp                     # flat output positions, row stride wp

    bm = max(128, _round_up(min(block_m, m_img), 128))
    m_pad = _round_up(m_img, bm)
    num_m = m_pad // bm
    halo = (kh - 1) * wp + (kw - 1)
    bm_ext = bm + _round_up(halo, 8)       # halo'd window rows per tile
    s_req = _round_up(m_pad - bm + bm_ext, 8)
    cin_p = _round_up(cin, 8)
    co_p = _round_up(cout, 8)              # sublane-granular channel padding
    f32 = jnp.float32

    # NCHW -> per-image channel-minor, spatially zero-padded & flattened with
    # row stride wp; zero tail so every halo'd window read stays in range.
    xp = jnp.pad(x, ((0, 0), (0, cin_p - cin), (pad, pad), (pad, pad)))
    x_flat = xp.transpose(0, 2, 3, 1).reshape(n, hp * wp, cin_p)
    x_flat = jnp.pad(x_flat, ((0, 0), (0, s_req - hp * wp), (0, 0)))
    x_flat = x_flat.astype(jnp.bfloat16)                     # (n, s_req, cin_p)

    # Weights: (Cout, Cin, kh, kw) -> per-tap (kh*kw, co_p, cin_p) bf16.
    w_p = jnp.pad(weight, ((0, co_p - cout), (0, cin_p - cin), (0, 0), (0, 0)))
    w_r = w_p.transpose(2, 3, 0, 1).reshape(kh * kw, co_p, cin_p)
    w_r = w_r.astype(jnp.bfloat16)

    # Validity mask over flat positions: drop the kw-1 wrap-around columns per
    # output row and the padded tail (pass-1 stats only; pass-2 extras are
    # simply sliced off in the wrapper).
    pos = jnp.arange(m_pad, dtype=jnp.int32)
    valid = ((pos % wp) < w_out) & (pos < m_img)
    mask = valid.astype(f32).reshape(1, m_pad)

    taps = tuple((i, j) for i in range(kh) for j in range(kw))
    cp_kwargs = {}
    if vmem_limit_bytes is not None:
        cp_kwargs["vmem_limit_bytes"] = vmem_limit_bytes

    flops = 2 * n * m_pad * len(taps) * co_p * cin_p
    x_bytes = x_flat.size * 2
    w_bytes = w_r.size * 2

    # ---- Pass 1: per-image per-channel batch statistics ----------------------
    stats_kernel = functools.partial(
        _stats_kernel, taps=taps, wp=wp, bm=bm, bm_ext=bm_ext)
    ch_sum, ch_sq = pl.pallas_call(
        stats_kernel,
        out_shape=(jax.ShapeDtypeStruct((n, co_p, 1), f32),
                   jax.ShapeDtypeStruct((n, co_p, 1), f32)),
        grid_spec=pltpu.PrefetchScalarGridSpec(
            num_scalar_prefetch=0,
            grid=(n, num_m),
            in_specs=[pl.BlockSpec((1, s_req, cin_p), lambda b, m: (b, 0, 0)),
                      pl.BlockSpec((kh * kw, co_p, cin_p),
                                   lambda b, m: (0, 0, 0)),
                      pl.BlockSpec((1, bm), lambda b, m: (0, m))],
            out_specs=(pl.BlockSpec((1, co_p, 1), lambda b, m: (b, 0, 0)),
                       pl.BlockSpec((1, co_p, 1), lambda b, m: (b, 0, 0))),
        ),
        compiler_params=pltpu.CompilerParams(
            # Per-image partial accumulators -> batch axis is parallel (v7x
            # splits it across its two TensorCores); M axis accumulates.
            dimension_semantics=("parallel", "arbitrary"), **cp_kwargs),
        cost_estimate=pl.CostEstimate(
            flops=flops, transcendentals=0,
            bytes_accessed=x_bytes + w_bytes + mask.size * 4 + 2 * n * co_p * 4),
    )(x_flat, w_r, mask)

    # ---- Fold BN (+ cancelled conv bias) into per-channel scale / shift ------
    count = n * h_out * w_out
    tot = jnp.sum(ch_sum, axis=0)                            # (co_p, 1) f32
    tot_sq = jnp.sum(ch_sq, axis=0)
    mu = tot / count
    var = jnp.maximum(tot_sq / count - mu * mu, 0.0)         # biased var
    inv = jax.lax.rsqrt(var + BN_EPS)
    gamma_p = jnp.pad(gamma.astype(f32), (0, co_p - cout)).reshape(co_p, 1)
    beta_p = jnp.pad(beta.astype(f32), (0, co_p - cout)).reshape(co_p, 1)
    s = gamma_p * inv
    t = beta_p - mu * s

    # ---- Pass 2: y = relu(conv * s + t), channel-major lane-dense tiles ------
    apply_kernel = functools.partial(
        _apply_kernel, taps=taps, wp=wp, bm=bm, bm_ext=bm_ext)
    out_flat = pl.pallas_call(
        apply_kernel,
        out_shape=jax.ShapeDtypeStruct((n, co_p, m_pad), x.dtype),
        grid_spec=pltpu.PrefetchScalarGridSpec(
            num_scalar_prefetch=0,
            grid=(n, num_m),
            in_specs=[pl.BlockSpec((1, s_req, cin_p), lambda b, m: (b, 0, 0)),
                      pl.BlockSpec((kh * kw, co_p, cin_p),
                                   lambda b, m: (0, 0, 0)),
                      pl.BlockSpec((co_p, 1), lambda b, m: (0, 0)),
                      pl.BlockSpec((co_p, 1), lambda b, m: (0, 0))],
            out_specs=pl.BlockSpec((1, co_p, bm), lambda b, m: (b, 0, m)),
        ),
        compiler_params=pltpu.CompilerParams(
            dimension_semantics=("parallel", "parallel"), **cp_kwargs),
        cost_estimate=pl.CostEstimate(
            flops=flops, transcendentals=0,
            bytes_accessed=(x_bytes + w_bytes + 4 * co_p * 4
                            + n * co_p * m_pad * x.dtype.itemsize)),
    )(x_flat, w_r, s, t)

    # Channel-major result reshapes straight to NCHW: slice channel / flat-M
    # padding and the kw-1 extra columns per row.  No transpose.
    out = out_flat[:, :cout, :m_img].reshape(n, cout, h_out, wp)
    return out[:, :, :, :w_out]


def _reference(x, weight, bias, gamma, beta, pad):
    conv = jax.lax.conv_general_dilated(
        x.astype(jnp.float32), weight.astype(jnp.float32),
        window_strides=(1, 1), padding=[(pad, pad), (pad, pad)],
        dimension_numbers=("NCHW", "OIHW", "NCHW"),
    ) + bias.reshape(1, -1, 1, 1)
    mu = jnp.mean(conv, axis=(0, 2, 3), keepdims=True)
    var = jnp.mean((conv - mu) ** 2, axis=(0, 2, 3), keepdims=True)
    y = (conv - mu) * jax.lax.rsqrt(var + BN_EPS)
    y = y * gamma.reshape(1, -1, 1, 1) + beta.reshape(1, -1, 1, 1)
    return jnp.maximum(y, 0.0)


if __name__ == "__main__":
    # BasicConv2d(in_channels=4, out_channels=8, kernel_size=3, padding=1)
    # applied to a (2, 4, 16, 16) NCHW input.
    N, CIN, H, W = 2, 4, 16, 16
    COUT, KH, KW, PAD = 8, 3, 3, 1

    key = jax.random.PRNGKey(0)
    kx, kw_, kb, kg, kbe = jax.random.split(key, 5)

    x = jax.random.normal(kx, (N, CIN, H, W), dtype=jnp.float32)
    weight = jax.random.normal(kw_, (COUT, CIN, KH, KW), dtype=jnp.float32) * 0.1
    bias = jax.random.normal(kb, (COUT,), dtype=jnp.float32) * 0.1
    gamma = 1.0 + 0.1 * jax.random.normal(kg, (COUT,), dtype=jnp.float32)
    beta = 0.1 * jax.random.normal(kbe, (COUT,), dtype=jnp.float32)

    # block_m=128 so the toy M=288 (16 rows x 18-wide padded stride) exercises
    # a real 3-tile grid (accumulator init/finalize and multi-tile apply pass).
    out = basic_conv2d(x, weight, bias, gamma, beta,
                       kh=KH, kw=KW, pad=PAD, block_m=128)
    out = jax.block_until_ready(out)

    ref = _reference(x, weight, bias, gamma, beta, PAD)
    assert out.shape == (N, COUT, H, W)
    # bf16 MXU operands (f32 accumulation / BN math) vs. the f32 reference:
    # expected max deviation is ~1e-2 on the normalized output.
    err = float(jnp.max(jnp.abs(out - ref)))
    assert jnp.allclose(out, ref, atol=3e-2, rtol=3e-2), err

    print("KERNEL_OK")
</pallas_src>

<mosaic_0001>
module attributes {stable_mosaic.version = 11 : i64} {
  func.func @_stats_kernel(%arg0: i32, %arg1: i32, %arg2: memref<1x424x8xbf16, #tpu.memory_space<vmem>>, %arg3: memref<9x8x8xbf16, #tpu.memory_space<vmem>>, %arg4: memref<1x128xf32, #tpu.memory_space<vmem>>, %arg5: memref<1x8x1xf32, #tpu.memory_space<vmem>>, %arg6: memref<1x8x1xf32, #tpu.memory_space<vmem>>) attributes {dimension_semantics = [#tpu.dimension_semantics<parallel>, #tpu.dimension_semantics<arbitrary>], iteration_bounds = array<i64: 2, 3>, scalar_prefetch = 0 : i64, scratch_operands = 0 : i64, tpu.core_type = #tpu.core_type<tc>, window_params = [{transform_indices = @transform_0, window_bounds = array<i64: 1, 424, 8>}, {pipeline_mode = #tpu.pipeline_mode<synchronous>, transform_indices = @transform_1, window_bounds = array<i64: 9, 8, 8>}, {transform_indices = @transform_2, window_bounds = array<i64: 1, 128>}, {transform_indices = @transform_3, window_bounds = array<i64: 1, 8, 1>}, {transform_indices = @transform_4, window_bounds = array<i64: 1, 8, 1>}]} {
    %c0_i32 = arith.constant 0 : i32
    %0 = arith.cmpi eq, %arg1, %c0_i32 : i32
    %1 = arith.extui %0 : i1 to i32
    %c0_i32_0 = arith.constant 0 : i32
    %2 = arith.cmpi ne, %1, %c0_i32_0 : i32
    scf.if %2 {
      %cst_45 = arith.constant 0.000000e+00 : f32
      %68 = vector.broadcast %cst_45 : f32 to vector<1x8x1xf32>
      %c0_46 = arith.constant 0 : index
      %c0_47 = arith.constant 0 : index
      %c0_48 = arith.constant 0 : index
      %69 = vector.load %arg5[%c0_46, %c0_47, %c0_48] : memref<1x8x1xf32, #tpu.memory_space<vmem>>, vector<1x8x1xf32>
      tpu.vector_store %arg5[%c0_46, %c0_47, %c0_48], %68 {strides = array<i32>} : memref<1x8x1xf32, #tpu.memory_space<vmem>>, vector<1x8x1xf32>,
      %cst_49 = arith.constant 0.000000e+00 : f32
      %70 = vector.broadcast %cst_49 : f32 to vector<1x8x1xf32>
      %c0_50 = arith.constant 0 : index
      %c0_51 = arith.constant 0 : index
      %c0_52 = arith.constant 0 : index
      %71 = vector.load %arg6[%c0_50, %c0_51, %c0_52] : memref<1x8x1xf32, #tpu.memory_space<vmem>>, vector<1x8x1xf32>
      tpu.vector_store %arg6[%c0_50, %c0_51, %c0_52], %70 {strides = array<i32>} : memref<1x8x1xf32, #tpu.memory_space<vmem>>, vector<1x8x1xf32>,
    } else {
    }
    %c128_i32 = arith.constant 128 : i32
    %3 = arith.muli %arg1, %c128_i32 : i32
    %4 = tpu.assume_multiple %3, 128 : i32
    %c0 = arith.constant 0 : index
    %5 = arith.index_cast %4 : i32 to index
    %c0_1 = arith.constant 0 : index
    %6 = vector.load %arg2[%c0, %5, %c0_1] : memref<1x424x8xbf16, #tpu.memory_space<vmem>>, vector<1x168x8xbf16>
    %7 = vector.shape_cast %6 : vector<1x168x8xbf16> to vector<168x8xbf16>
    %8 = vector.extract_strided_slice %7 {offsets = [0, 0], sizes = [128, 8], strides = [1, 1]} : vector<168x8xbf16> to vector<128x8xbf16>
    %c0_2 = arith.constant 0 : index
    %c0_3 = arith.constant 0 : index
    %c0_4 = arith.constant 0 : index
    %9 = vector.load %arg3[%c0_2, %c0_3, %c0_4] : memref<9x8x8xbf16, #tpu.memory_space<vmem>>, vector<1x8x8xbf16>
    %10 = vector.shape_cast %9 : vector<1x8x8xbf16> to vector<8x8xbf16>
    %cst = arith.constant dense<0.000000e+00> : vector<8x128xf32>
    %11 = tpu.matmul %10, %8, %cst {dimension_numbers = #tpu.dot_dimension_numbers<[1], [1], [0], [0], [0, 0, 1, 0], [], []>} : vector<8x8xbf16>, vector<128x8xbf16>, vector<8x128xf32> -> vector<8x128xf32>
    %12 = vector.extract_strided_slice %7 {offsets = [1, 0], sizes = [128, 8], strides = [1, 1]} : vector<168x8xbf16> to vector<128x8xbf16>
    %c1 = arith.constant 1 : index
    %c0_5 = arith.constant 0 : index
    %c0_6 = arith.constant 0 : index
    %13 = vector.load %arg3[%c1, %c0_5, %c0_6] : memref<9x8x8xbf16, #tpu.memory_space<vmem>>, vector<1x8x8xbf16>
    %14 = vector.shape_cast %13 : vector<1x8x8xbf16> to vector<8x8xbf16>
    %cst_7 = arith.constant dense<0.000000e+00> : vector<8x128xf32>
    %15 = tpu.matmul %14, %12, %cst_7 {dimension_numbers = #tpu.dot_dimension_numbers<[1], [1], [0], [0], [0, 0, 1, 0], [], []>} : vector<8x8xbf16>, vector<128x8xbf16>, vector<8x128xf32> -> vector<8x128xf32>
    %16 = arith.addf %11, %15 : vector<8x128xf32>
    %17 = vector.extract_strided_slice %7 {offsets = [2, 0], sizes = [128, 8], strides = [1, 1]} : vector<168x8xbf16> to vector<128x8xbf16>
    %c2 = arith.constant 2 : index
    %c0_8 = arith.constant 0 : index
    %c0_9 = arith.constant 0 : index
    %18 = vector.load %arg3[%c2, %c0_8, %c0_9] : memref<9x8x8xbf16, #tpu.memory_space<vmem>>, vector<1x8x8xbf16>
    %19 = vector.shape_cast %18 : vector<1x8x8xbf16> to vector<8x8xbf16>
    %cst_10 = arith.constant dense<0.000000e+00> : vector<8x128xf32>
    %20 = tpu.matmul %19, %17, %cst_10 {dimension_numbers = #tpu.dot_dimension_numbers<[1], [1], [0], [0], [0, 0, 1, 0], [], []>} : vector<8x8xbf16>, vector<128x8xbf16>, vector<8x128xf32> -> vector<8x128xf32>
    %21 = arith.addf %16, %20 : vector<8x128xf32>
    %22 = vector.extract_strided_slice %7 {offsets = [18, 0], sizes = [128, 8], strides = [1, 1]} : vector<168x8xbf16> to vector<128x8xbf16>
    %c3 = arith.constant 3 : index
    %c0_11 = arith.constant 0 : index
    %c0_12 = arith.constant 0 : index
    %23 = vector.load %arg3[%c3, %c0_11, %c0_12] : memref<9x8x8xbf16, #tpu.memory_space<vmem>>, vector<1x8x8xbf16>
    %24 = vector.shape_cast %23 : vector<1x8x8xbf16> to vector<8x8xbf16>
    %cst_13 = arith.constant dense<0.000000e+00> : vector<8x128xf32>
    %25 = tpu.matmul %24, %22, %cst_13 {dimension_numbers = #tpu.dot_dimension_numbers<[1], [1], [0], [0], [0, 0, 1, 0], [], []>} : vector<8x8xbf16>, vector<128x8xbf16>, vector<8x128xf32> -> vector<8x128xf32>
    %26 = arith.addf %21, %25 : vector<8x128xf32>
    %27 = vector.extract_strided_slice %7 {offsets = [19, 0], sizes = [128, 8], strides = [1, 1]} : vector<168x8xbf16> to vector<128x8xbf16>
    %c4 = arith.constant 4 : index
    %c0_14 = arith.constant 0 : index
    %c0_15 = arith.constant 0 : index
    %28 = vector.load %arg3[%c4, %c0_14, %c0_15] : memref<9x8x8xbf16, #tpu.memory_space<vmem>>, vector<1x8x8xbf16>
    %29 = vector.shape_cast %28 : vector<1x8x8xbf16> to vector<8x8xbf16>
    %cst_16 = arith.constant dense<0.000000e+00> : vector<8x128xf32>
    %30 = tpu.matmul %29, %27, %cst_16 {dimension_numbers = #tpu.dot_dimension_numbers<[1], [1], [0], [0], [0, 0, 1, 0], [], []>} : vector<8x8xbf16>, vector<128x8xbf16>, vector<8x128xf32> -> vector<8x128xf32>
    %31 = arith.addf %26, %30 : vector<8x128xf32>
    %32 = vector.extract_strided_slice %7 {offsets = [20, 0], sizes = [128, 8], strides = [1, 1]} : vector<168x8xbf16> to vector<128x8xbf16>
    %c5 = arith.constant 5 : index
    %c0_17 = arith.constant 0 : index
    %c0_18 = arith.constant 0 : index
    %33 = vector.load %arg3[%c5, %c0_17, %c0_18] : memref<9x8x8xbf16, #tpu.memory_space<vmem>>, vector<1x8x8xbf16>
    %34 = vector.shape_cast %33 : vector<1x8x8xbf16> to vector<8x8xbf16>
    %cst_19 = arith.constant dense<0.000000e+00> : vector<8x128xf32>
    %35 = tpu.matmul %34, %32, %cst_19 {dimension_numbers = #tpu.dot_dimension_numbers<[1], [1], [0], [0], [0, 0, 1, 0], [], []>} : vector<8x8xbf16>, vector<128x8xbf16>, vector<8x128xf32> -> vector<8x128xf32>
    %36 = arith.addf %31, %35 : vector<8x128xf32>
    %37 = vector.extract_strided_slice %7 {offsets = [36, 0], sizes = [128, 8], strides = [1, 1]} : vector<168x8xbf16> to vector<128x8xbf16>
    %c6 = arith.constant 6 : index
    %c0_20 = arith.constant 0 : index
    %c0_21 = arith.constant 0 : index
    %38 = vector.load %arg3[%c6, %c0_20, %c0_21] : memref<9x8x8xbf16, #tpu.memory_space<vmem>>, vector<1x8x8xbf16>
    %39 = vector.shape_cast %38 : vector<1x8x8xbf16> to vector<8x8xbf16>
    %cst_22 = arith.constant dense<0.000000e+00> : vector<8x128xf32>
    %40 = tpu.matmul %39, %37, %cst_22 {dimension_numbers = #tpu.dot_dimension_numbers<[1], [1], [0], [0], [0, 0, 1, 0], [], []>} : vector<8x8xbf16>, vector<128x8xbf16>, vector<8x128xf32> -> vector<8x128xf32>
    %41 = arith.addf %36, %40 : vector<8x128xf32>
    %42 = vector.extract_strided_slice %7 {offsets = [37, 0], sizes = [128, 8], strides = [1, 1]} : vector<168x8xbf16> to vector<128x8xbf16>
    %c7 = arith.constant 7 : index
    %c0_23 = arith.constant 0 : index
    %c0_24 = arith.constant 0 : index
    %43 = vector.load %arg3[%c7, %c0_23, %c0_24] : memref<9x8x8xbf16, #tpu.memory_space<vmem>>, vector<1x8x8xbf16>
    %44 = vector.shape_cast %43 : vector<1x8x8xbf16> to vector<8x8xbf16>
    %cst_25 = arith.constant dense<0.000000e+00> : vector<8x128xf32>
    %45 = tpu.matmul %44, %42, %cst_25 {dimension_numbers = #tpu.dot_dimension_numbers<[1], [1], [0], [0], [0, 0, 1, 0], [], []>} : vector<8x8xbf16>, vector<128x8xbf16>, vector<8x128xf32> -> vector<8x128xf32>
    %46 = arith.addf %41, %45 : vector<8x128xf32>
    %47 = vector.extract_strided_slice %7 {offsets = [38, 0], sizes = [128, 8], strides = [1, 1]} : vector<168x8xbf16> to vector<128x8xbf16>
    %c8 = arith.constant 8 : index
    %c0_26 = arith.constant 0 : index
    %c0_27 = arith.constant 0 : index
    %48 = vector.load %arg3[%c8, %c0_26, %c0_27] : memref<9x8x8xbf16, #tpu.memory_space<vmem>>, vector<1x8x8xbf16>
    %49 = vector.shape_cast %48 : vector<1x8x8xbf16> to vector<8x8xbf16>
    %cst_28 = arith.constant dense<0.000000e+00> : vector<8x128xf32>
    %50 = tpu.matmul %49, %47, %cst_28 {dimension_numbers = #tpu.dot_dimension_numbers<[1], [1], [0], [0], [0, 0, 1, 0], [], []>} : vector<8x8xbf16>, vector<128x8xbf16>, vector<8x128xf32> -> vector<8x128xf32>
    %51 = arith.addf %46, %50 : vector<8x128xf32>
    %c0_29 = arith.constant 0 : index
    %c0_30 = arith.constant 0 : index
    %52 = vector.load %arg4[%c0_29, %c0_30] : memref<1x128xf32, #tpu.memory_space<vmem>>, vector<1x128xf32>
    %53 = vector.broadcast %52 : vector<1x128xf32> to vector<8x128xf32>
    %54 = arith.mulf %51, %53 : vector<8x128xf32>
    %c0_31 = arith.constant 0 : index
    %c0_32 = arith.constant 0 : index
    %c0_33 = arith.constant 0 : index
    %55 = vector.load %arg5[%c0_31, %c0_32, %c0_33] : memref<1x8x1xf32, #tpu.memory_space<vmem>>, vector<1x8x1xf32>
    %cst_34 = arith.constant dense<0.000000e+00> : vector<8xf32>
    %56 = vector.multi_reduction <add>, %54, %cst_34 [1] : vector<8x128xf32> to vector<8xf32>
    %57 = vector.shape_cast %56 : vector<8xf32> to vector<8x1xf32>
    %58 = vector.shape_cast %57 : vector<8x1xf32> to vector<1x8x1xf32>
    %59 = arith.addf %55, %58 : vector<1x8x1xf32>
    %c0_35 = arith.constant 0 : index
    %c0_36 = arith.constant 0 : index
    %c0_37 = arith.constant 0 : index
    %60 = vector.load %arg5[%c0_35, %c0_36, %c0_37] : memref<1x8x1xf32, #tpu.memory_space<vmem>>, vector<1x8x1xf32>
    tpu.vector_store %arg5[%c0_35, %c0_36, %c0_37], %59 {strides = array<i32>} : memref<1x8x1xf32, #tpu.memory_space<vmem>>, vector<1x8x1xf32>,
    %c0_38 = arith.constant 0 : index
    %c0_39 = arith.constant 0 : index
    %c0_40 = arith.constant 0 : index
    %61 = vector.load %arg6[%c0_38, %c0_39, %c0_40] : memref<1x8x1xf32, #tpu.memory_space<vmem>>, vector<1x8x1xf32>
    %62 = arith.mulf %54, %54 : vector<8x128xf32>
    %cst_41 = arith.constant dense<0.000000e+00> : vector<8xf32>
    %63 = vector.multi_reduction <add>, %62, %cst_41 [1] : vector<8x128xf32> to vector<8xf32>
    %64 = vector.shape_cast %63 : vector<8xf32> to vector<8x1xf32>
    %65 = vector.shape_cast %64 : vector<8x1xf32> to vector<1x8x1xf32>
    %66 = arith.addf %61, %65 : vector<1x8x1xf32>
    %c0_42 = arith.constant 0 : index
    %c0_43 = arith.constant 0 : index
    %c0_44 = arith.constant 0 : index
    %67 = vector.load %arg6[%c0_42, %c0_43, %c0_44] : memref<1x8x1xf32, #tpu.memory_space<vmem>>, vector<1x8x1xf32>
    tpu.vector_store %arg6[%c0_42, %c0_43, %c0_44], %66 {strides = array<i32>} : memref<1x8x1xf32, #tpu.memory_space<vmem>>, vector<1x8x1xf32>,
    return
  }
  func.func @transform_0(%arg0: i32, %arg1: i32) -> (i32, i32, i32) {
    %c0_i32 = arith.constant 0 : i32
    %c0_i32_0 = arith.constant 0 : i32
    %c0_i32_1 = arith.constant 0 : i32
    return %arg0, %c0_i32, %c0_i32_0 : i32, i32, i32
  }
  func.func @transform_1(%arg0: i32, %arg1: i32) -> (i32, i32, i32) {
    %c0_i32 = arith.constant 0 : i32
    %c0_i32_0 = arith.constant 0 : i32
    %c0_i32_1 = arith.constant 0 : i32
    %c0_i32_2 = arith.constant 0 : i32
    return %c0_i32, %c0_i32_0, %c0_i32_1 : i32, i32, i32
  }
  func.func @transform_2(%arg0: i32, %arg1: i32) -> (i32, i32) {
    %c0_i32 = arith.constant 0 : i32
    %c0_i32_0 = arith.constant 0 : i32
    return %c0_i32, %arg1 : i32, i32
  }
  func.func @transform_3(%arg0: i32, %arg1: i32) -> (i32, i32, i32) {
    %c0_i32 = arith.constant 0 : i32
    %c0_i32_0 = arith.constant 0 : i32
    %c0_i32_1 = arith.constant 0 : i32
    return %arg0, %c0_i32, %c0_i32_0 : i32, i32, i32
  }
  func.func @transform_4(%arg0: i32, %arg1: i32) -> (i32, i32, i32) {
    %c0_i32 = arith.constant 0 : i32
    %c0_i32_0 = arith.constant 0 : i32
    %c0_i32_1 = arith.constant 0 : i32
    return %arg0, %c0_i32, %c0_i32_0 : i32, i32, i32
  }
}

module attributes {stable_mosaic.version = 11 : i64} {
  func.func @_apply_kernel(%arg0: i32, %arg1: i32, %arg2: memref<1x424x8xbf16, #tpu.memory_space<vmem>>, %arg3: memref<9x8x8xbf16, #tpu.memory_space<vmem>>, %arg4: memref<8x1xf32, #tpu.memory_space<vmem>>, %arg5: memref<8x1xf32, #tpu.memory_space<vmem>>, %arg6: memref<1x8x128xf32, #tpu.memory_space<vmem>>) attributes {dimension_semantics = [#tpu.dimension_semantics<parallel>, #tpu.dimension_semantics<parallel>], iteration_bounds = array<i64: 2, 3>, scalar_prefetch = 0 : i64, scratch_operands = 0 : i64, tpu.core_type = #tpu.core_type<tc>, window_params = [{transform_indices = @transform_0, window_bounds = array<i64: 1, 424, 8>}, {pipeline_mode = #tpu.pipeline_mode<synchronous>, transform_indices = @transform_1, window_bounds = array<i64: 9, 8, 8>}, {pipeline_mode = #tpu.pipeline_mode<synchronous>, transform_indices = @transform_2, window_bounds = array<i64: 8, 1>}, {pipeline_mode = #tpu.pipeline_mode<synchronous>, transform_indices = @transform_3, window_bounds = array<i64: 8, 1>}, {transform_indices = @transform_4, window_bounds = array<i64: 1, 8, 128>}]} {
    %c128_i32 = arith.constant 128 : i32
    %0 = arith.muli %arg1, %c128_i32 : i32
    %1 = tpu.assume_multiple %0, 128 : i32
    %c0 = arith.constant 0 : index
    %2 = arith.index_cast %1 : i32 to index
    %c0_0 = arith.constant 0 : index
    %3 = vector.load %arg2[%c0, %2, %c0_0] : memref<1x424x8xbf16, #tpu.memory_space<vmem>>, vector<1x168x8xbf16>
    %4 = vector.shape_cast %3 : vector<1x168x8xbf16> to vector<168x8xbf16>
    %5 = vector.extract_strided_slice %4 {offsets = [0, 0], sizes = [128, 8], strides = [1, 1]} : vector<168x8xbf16> to vector<128x8xbf16>
    %c0_1 = arith.constant 0 : index
    %c0_2 = arith.constant 0 : index
    %c0_3 = arith.constant 0 : index
    %6 = vector.load %arg3[%c0_1, %c0_2, %c0_3] : memref<9x8x8xbf16, #tpu.memory_space<vmem>>, vector<1x8x8xbf16>
    %7 = vector.shape_cast %6 : vector<1x8x8xbf16> to vector<8x8xbf16>
    %cst = arith.constant dense<0.000000e+00> : vector<8x128xf32>
    %8 = tpu.matmul %7, %5, %cst {dimension_numbers = #tpu.dot_dimension_numbers<[1], [1], [0], [0], [0, 0, 1, 0], [], []>} : vector<8x8xbf16>, vector<128x8xbf16>, vector<8x128xf32> -> vector<8x128xf32>
    %9 = vector.extract_strided_slice %4 {offsets = [1, 0], sizes = [128, 8], strides = [1, 1]} : vector<168x8xbf16> to vector<128x8xbf16>
    %c1 = arith.constant 1 : index
    %c0_4 = arith.constant 0 : index
    %c0_5 = arith.constant 0 : index
    %10 = vector.load %arg3[%c1, %c0_4, %c0_5] : memref<9x8x8xbf16, #tpu.memory_space<vmem>>, vector<1x8x8xbf16>
    %11 = vector.shape_cast %10 : vector<1x8x8xbf16> to vector<8x8xbf16>
    %cst_6 = arith.constant dense<0.000000e+00> : vector<8x128xf32>
    %12 = tpu.matmul %11, %9, %cst_6 {dimension_numbers = #tpu.dot_dimension_numbers<[1], [1], [0], [0], [0, 0, 1, 0], [], []>} : vector<8x8xbf16>, vector<128x8xbf16>, vector<8x128xf32> -> vector<8x128xf32>
    %13 = arith.addf %8, %12 : vector<8x128xf32>
    %14 = vector.extract_strided_slice %4 {offsets = [2, 0], sizes = [128, 8], strides = [1, 1]} : vector<168x8xbf16> to vector<128x8xbf16>
    %c2 = arith.constant 2 : index
    %c0_7 = arith.constant 0 : index
    %c0_8 = arith.constant 0 : index
    %15 = vector.load %arg3[%c2, %c0_7, %c0_8] : memref<9x8x8xbf16, #tpu.memory_space<vmem>>, vector<1x8x8xbf16>
    %16 = vector.shape_cast %15 : vector<1x8x8xbf16> to vector<8x8xbf16>
    %cst_9 = arith.constant dense<0.000000e+00> : vector<8x128xf32>
    %17 = tpu.matmul %16, %14, %cst_9 {dimension_numbers = #tpu.dot_dimension_numbers<[1], [1], [0], [0], [0, 0, 1, 0], [], []>} : vector<8x8xbf16>, vector<128x8xbf16>, vector<8x128xf32> -> vector<8x128xf32>
    %18 = arith.addf %13, %17 : vector<8x128xf32>
    %19 = vector.extract_strided_slice %4 {offsets = [18, 0], sizes = [128, 8], strides = [1, 1]} : vector<168x8xbf16> to vector<128x8xbf16>
    %c3 = arith.constant 3 : index
    %c0_10 = arith.constant 0 : index
    %c0_11 = arith.constant 0 : index
    %20 = vector.load %arg3[%c3, %c0_10, %c0_11] : memref<9x8x8xbf16, #tpu.memory_space<vmem>>, vector<1x8x8xbf16>
    %21 = vector.shape_cast %20 : vector<1x8x8xbf16> to vector<8x8xbf16>
    %cst_12 = arith.constant dense<0.000000e+00> : vector<8x128xf32>
    %22 = tpu.matmul %21, %19, %cst_12 {dimension_numbers = #tpu.dot_dimension_numbers<[1], [1], [0], [0], [0, 0, 1, 0], [], []>} : vector<8x8xbf16>, vector<128x8xbf16>, vector<8x128xf32> -> vector<8x128xf32>
    %23 = arith.addf %18, %22 : vector<8x128xf32>
    %24 = vector.extract_strided_slice %4 {offsets = [19, 0], sizes = [128, 8], strides = [1, 1]} : vector<168x8xbf16> to vector<128x8xbf16>
    %c4 = arith.constant 4 : index
    %c0_13 = arith.constant 0 : index
    %c0_14 = arith.constant 0 : index
    %25 = vector.load %arg3[%c4, %c0_13, %c0_14] : memref<9x8x8xbf16, #tpu.memory_space<vmem>>, vector<1x8x8xbf16>
    %26 = vector.shape_cast %25 : vector<1x8x8xbf16> to vector<8x8xbf16>
    %cst_15 = arith.constant dense<0.000000e+00> : vector<8x128xf32>
    %27 = tpu.matmul %26, %24, %cst_15 {dimension_numbers = #tpu.dot_dimension_numbers<[1], [1], [0], [0], [0, 0, 1, 0], [], []>} : vector<8x8xbf16>, vector<128x8xbf16>, vector<8x128xf32> -> vector<8x128xf32>
    %28 = arith.addf %23, %27 : vector<8x128xf32>
    %29 = vector.extract_strided_slice %4 {offsets = [20, 0], sizes = [128, 8], strides = [1, 1]} : vector<168x8xbf16> to vector<128x8xbf16>
    %c5 = arith.constant 5 : index
    %c0_16 = arith.constant 0 : index
    %c0_17 = arith.constant 0 : index
    %30 = vector.load %arg3[%c5, %c0_16, %c0_17] : memref<9x8x8xbf16, #tpu.memory_space<vmem>>, vector<1x8x8xbf16>
    %31 = vector.shape_cast %30 : vector<1x8x8xbf16> to vector<8x8xbf16>
    %cst_18 = arith.constant dense<0.000000e+00> : vector<8x128xf32>
    %32 = tpu.matmul %31, %29, %cst_18 {dimension_numbers = #tpu.dot_dimension_numbers<[1], [1], [0], [0], [0, 0, 1, 0], [], []>} : vector<8x8xbf16>, vector<128x8xbf16>, vector<8x128xf32> -> vector<8x128xf32>
    %33 = arith.addf %28, %32 : vector<8x128xf32>
    %34 = vector.extract_strided_slice %4 {offsets = [36, 0], sizes = [128, 8], strides = [1, 1]} : vector<168x8xbf16> to vector<128x8xbf16>
    %c6 = arith.constant 6 : index
    %c0_19 = arith.constant 0 : index
    %c0_20 = arith.constant 0 : index
    %35 = vector.load %arg3[%c6, %c0_19, %c0_20] : memref<9x8x8xbf16, #tpu.memory_space<vmem>>, vector<1x8x8xbf16>
    %36 = vector.shape_cast %35 : vector<1x8x8xbf16> to vector<8x8xbf16>
    %cst_21 = arith.constant dense<0.000000e+00> : vector<8x128xf32>
    %37 = tpu.matmul %36, %34, %cst_21 {dimension_numbers = #tpu.dot_dimension_numbers<[1], [1], [0], [0], [0, 0, 1, 0], [], []>} : vector<8x8xbf16>, vector<128x8xbf16>, vector<8x128xf32> -> vector<8x128xf32>
    %38 = arith.addf %33, %37 : vector<8x128xf32>
    %39 = vector.extract_strided_slice %4 {offsets = [37, 0], sizes = [128, 8], strides = [1, 1]} : vector<168x8xbf16> to vector<128x8xbf16>
    %c7 = arith.constant 7 : index
    %c0_22 = arith.constant 0 : index
    %c0_23 = arith.constant 0 : index
    %40 = vector.load %arg3[%c7, %c0_22, %c0_23] : memref<9x8x8xbf16, #tpu.memory_space<vmem>>, vector<1x8x8xbf16>
    %41 = vector.shape_cast %40 : vector<1x8x8xbf16> to vector<8x8xbf16>
    %cst_24 = arith.constant dense<0.000000e+00> : vector<8x128xf32>
    %42 = tpu.matmul %41, %39, %cst_24 {dimension_numbers = #tpu.dot_dimension_numbers<[1], [1], [0], [0], [0, 0, 1, 0], [], []>} : vector<8x8xbf16>, vector<128x8xbf16>, vector<8x128xf32> -> vector<8x128xf32>
    %43 = arith.addf %38, %42 : vector<8x128xf32>
    %44 = vector.extract_strided_slice %4 {offsets = [38, 0], sizes = [128, 8], strides = [1, 1]} : vector<168x8xbf16> to vector<128x8xbf16>
    %c8 = arith.constant 8 : index
    %c0_25 = arith.constant 0 : index
    %c0_26 = arith.constant 0 : index
    %45 = vector.load %arg3[%c8, %c0_25, %c0_26] : memref<9x8x8xbf16, #tpu.memory_space<vmem>>, vector<1x8x8xbf16>
    %46 = vector.shape_cast %45 : vector<1x8x8xbf16> to vector<8x8xbf16>
    %cst_27 = arith.constant dense<0.000000e+00> : vector<8x128xf32>
    %47 = tpu.matmul %46, %44, %cst_27 {dimension_numbers = #tpu.dot_dimension_numbers<[1], [1], [0], [0], [0, 0, 1, 0], [], []>} : vector<8x8xbf16>, vector<128x8xbf16>, vector<8x128xf32> -> vector<8x128xf32>
    %48 = arith.addf %43, %47 : vector<8x128xf32>
    %c0_28 = arith.constant 0 : index
    %c0_29 = arith.constant 0 : index
    %49 = vector.load %arg4[%c0_28, %c0_29] : memref<8x1xf32, #tpu.memory_space<vmem>>, vector<8x1xf32>
    %50 = vector.broadcast %49 : vector<8x1xf32> to vector<8x128xf32>
    %51 = arith.mulf %48, %50 : vector<8x128xf32>
    %c0_30 = arith.constant 0 : index
    %c0_31 = arith.constant 0 : index
    %52 = vector.load %arg5[%c0_30, %c0_31] : memref<8x1xf32, #tpu.memory_space<vmem>>, vector<8x1xf32>
    %53 = vector.broadcast %52 : vector<8x1xf32> to vector<8x128xf32>
    %54 = arith.addf %51, %53 : vector<8x128xf32>
    %cst_32 = arith.constant 0.000000e+00 : f32
    %55 = vector.broadcast %cst_32 : f32 to vector<8x128xf32>
    %56 = arith.maximumf %54, %55 : vector<8x128xf32>
    %57 = vector.shape_cast %56 : vector<8x128xf32> to vector<1x8x128xf32>
    %c0_33 = arith.constant 0 : index
    %c0_34 = arith.constant 0 : index
    %c0_35 = arith.constant 0 : index
    %58 = vector.load %arg6[%c0_33, %c0_34, %c0_35] : memref<1x8x128xf32, #tpu.memory_space<vmem>>, vector<1x8x128xf32>
    tpu.vector_store %arg6[%c0_33, %c0_34, %c0_35], %57 {strides = array<i32>} : memref<1x8x128xf32, #tpu.memory_space<vmem>>, vector<1x8x128xf32>,
    return
  }
  func.func @transform_0(%arg0: i32, %arg1: i32) -> (i32, i32, i32) {
    %c0_i32 = arith.constant 0 : i32
    %c0_i32_0 = arith.constant 0 : i32
    %c0_i32_1 = arith.constant 0 : i32
    return %arg0, %c0_i32, %c0_i32_0 : i32, i32, i32
  }
  func.func @transform_1(%arg0: i32, %arg1: i32) -> (i32, i32, i32) {
    %c0_i32 = arith.constant 0 : i32
    %c0_i32_0 = arith.constant 0 : i32
    %c0_i32_1 = arith.constant 0 : i32
    %c0_i32_2 = arith.constant 0 : i32
    return %c0_i32, %c0_i32_0, %c0_i32_1 : i32, i32, i32
  }
  func.func @transform_2(%arg0: i32, %arg1: i32) -> (i32, i32) {
    %c0_i32 = arith.constant 0 : i32
    %c0_i32_0 = arith.constant 0 : i32
    %c0_i32_1 = arith.constant 0 : i32
    return %c0_i32, %c0_i32_0 : i32, i32
  }
  func.func @transform_3(%arg0: i32, %arg1: i32) -> (i32, i32) {
    %c0_i32 = arith.constant 0 : i32
    %c0_i32_0 = arith.constant 0 : i32
    %c0_i32_1 = arith.constant 0 : i32
    return %c0_i32, %c0_i32_0 : i32, i32
  }
  func.func @transform_4(%arg0: i32, %arg1: i32) -> (i32, i32, i32) {
    %c0_i32 = arith.constant 0 : i32
    %c0_i32_0 = arith.constant 0 : i32
    return %arg0, %c0_i32, %arg1 : i32, i32, i32
  }
}

</mosaic_0001>

<bundles_post_ra>
// kernel: basic_conv2d.3
= control target key start
LH: loop header
LB: loop body
LE: loop exit
PB: predicated region body
PF: predicated region fallthrough
CT: control target
= control target key end

     0   :  { %s1663_s15 = smov 0   ;;  %s1665_s16 = smov 0   ;;  %s2191_s0 = inlined_call_operand.vmem [shape: bf16[2,424,8], index: 0, kind: input, shape index: {}]   ;;  %s2192_s1 = inlined_call_operand.vmem [shape: bf16[9,8,8], index: 1, kind: input, shape index: {}]   ;;  %s2193_s2 = inlined_call_operand.vmem [shape: f32[8,1], index: 2, kind: input, shape index: {}]   ;;  %s2194_s3 = inlined_call_operand.vmem [shape: f32[8,1], index: 3, kind: input, shape index: {}]   ;;  %s2195_s4 = inlined_call_operand.vmem [shape: f32[2,8,384], index: 4, kind: output, shape index: {}]  }
   0x1   :  { %s1667_s17 = smov 0   ;;  %s1669_s18 = smov 0  }
   0x2   :  { %s1671_s19 = smov 0  }
   0x3 LB: > { %s23_s20 = sadd.s32 1, %s1625_s17  ;;  %s26_s21 = sadd.s32 1, %s1629_s18  ;;  %s1633_s19 = sphi %s1671_s19, %s14_s19   ;;  %s1629_s18 = sphi %s1669_s18, %s2199_s18   ;;  %s1625_s17 = sphi %s1667_s17, %s2198_s17   ;;  %s1621_s16 = sphi %s1665_s16, %s2197_s16   ;;  %s1617_s15 = sphi %s1663_s15, %s2196_s15  }
   0x4   : > { %p24_p0 = scmp.ge.s32.totalorder %s23_s20, 3  ;;  %p1209_p1 = scmp.ge.s32.totalorder %s1633_s19, 1 }
   0x5   : > { %p176_p2 = scmp.lt.s32.totalorder %s1633_s19, 7 }
   0x6   : > { %s2201_s20 = smov (%p24_p0, %s23_s20), 0  ;;  %s2203_s21 = smov (!%p24_p0, %s26_s21), %s1629_s18 }
   0x7   : > { %p177_p3 = pnand %p1209_p1, %p176_p2  ;;  %p28_p4 = scmp.ge.s32.totalorder %s2203_s21, 2 }
   0x8   : > { %p205_p5 = scmp.lt.s32.totalorder (!%p177_p3), %s1621_s16, 1  ;;  %s1212_s22 = sshll.u32 (!%p177_p3), %s1617_s15, 7  ;;  %v1635_v0 = vmov (!%p177_p3), 0.0   ;;  %vm1636_vm0 = vmmov (!%p177_p3), 0   ;;  %vm291_vm1 = vsmask.f32 (!%p177_p3), 7424 }
   0x9   : > { %s2205_s21 = smov (%p28_p4, %s2203_s21), 0  ;;  %180 = sbr.rel (%p177_p3) target bundleno = 571 (0x23b), region = 36 }
   0xa   : > { %1327 = vmatprep.subr.bf16.mxu1 (!%p177_p3), %v1635_v0  ;;  %1407 = vmatprep.subr.bf16.mxu0 (!%p177_p3), %v1635_v0  ;;  %s220_s23 = sshra.s32 (!%p177_p3), %s1212_s22, 3  ;;  %vm639_vm2 = vsmask.f32 (!%p177_p3), 6400  ;;  %vm360_vm3 = vcmask (!%p177_p3), 64512   ;;  %vm489_vm4 = vcmask (!%p177_p3), 1046528   ;;  %vm755_vm5 = vcmask (!%p177_p3), 1045504  }
   0xb   : > { %1343 = vmatprep.mubr.msk.bf16.mxu1 (!%p177_p3), %vm1636_vm0, %v1635_v0  ;;  %1423 = vmatprep.mubr.msk.bf16.mxu0 (!%p177_p3), %vm1636_vm0, %v1635_v0  ;;  %s1213_s25 = sshll.u32 (!%p177_p3), %s220_s23, 2  ;;  %vm905_vm6 = vsmask.f32 (!%p177_p3), 5376  ;;  %vm1021_vm7 = vcmask (!%p177_p3), 1044480   ;;  %p212_p6 = scmp.lt.s32.totalorder (!%p177_p3), %s1617_s15, 2 }
  0x10   : > { %s2207_s16 = smov (!%p205_p5, %s1621_s16), 1  ;;  %s2209_s15 = smov (!%p212_p6, %s1617_s15), 2 }
  0x11   : > { %s1536_s24 = smul.u32 212, %s2207_s16 }
  0x12   : > { %s1537_s7 = smul.u32 3, %s2207_s16 }
  0x13   : > { %s209_s28 = scalar_lea.vmem %s2191_s0, %s1536_s24 }
  0x14   : > { %s1708_s29 = scalar_lea.vmem %s209_s28, %s1213_s25  ;;  %s215_s8 = sadd.s32 %s1537_s7, %s2209_s15 }
  0x15   : > { %v1711_v1 = vld [vmem:[%s1708_s29] sm:$0xff]   ;;  %v1714_v2 = vld [vmem:[%s1708_s29 + $0x8] sm:$0xff]   ;;  %v1717_v3 = vld [vmem:[%s1708_s29 + $0x10] sm:$0xff]   ;;  %s1211_s9 = sshll.u32 %s215_s8, 3 }
  0x16   : > { %v293_v4 = vshrl.u32 %v1711_v1, 16  ;;  %v295_v5 = vshll.u32 %v1711_v1, 16  ;;  %v300_v6 = vshll.u32 %v1714_v2, 16  ;;  %v304_v7 = vshrl.u32 %v1714_v2, 16  ;;  %v1730_v10 = vld [vmem:[%s1708_s29 + $0x18] sm:$0xff]   ;;  %v1738_v18 = vld [vmem:[%s1708_s29 + $0x20] sm:$0xff]   ;;  %s217_s12 = scalar_lea.vmem %s2195_s4, %s1211_s9 }
  0x17   : > { %v1724_v8 = vshll.u32 %v1717_v3, 16  ;;  %v1727_v9 = vshrl.u32 %v1717_v3, 16  ;;  %v1735_v17 = vshll.u32 %v1730_v10, 16  ;;  %v1741_v21 = vshrl.u32 %v1730_v10, 16  ;;  %v1763_v38 = vld [vmem:[%s1708_s29 + $0x28] sm:$0xff]   ;;  %v1782_v50 = vld [vmem:[%s1708_s29 + $0x30] sm:$0xff]  }
  0x18   : > { %v297_v11 = vrot.slane %v295_v5, 1  ;;  %v302_v12 = vrot.slane %v300_v6, 1  ;;  %v640_v13 = vrot.slane %v304_v7, 1  ;;  %v641_v14 = vrot.slane %v300_v6, 2  ;;  %v1798_v59 = vld [vmem:[%s1708_s29 + $0x38] sm:$0xff]  }
  0x19   : > { %v643_v15 = vrot.slane %v1727_v9, 1  ;;  %v644_v16 = vrot.slane %v1724_v8, 2  ;;  %v648_v23 = vrot.slane %v1735_v17, 2  ;;  %v310_v26 = vrot.slane %v1724_v8, 1 }
  0x1a   : > { %v298_v19 = vor.u32 %v297_v11, %v293_v4  ;;  %v642_v20 = vor.u32 %v641_v14, %v640_v13  ;;  %v306_v25 = vor.u32 %v304_v7, %v302_v12  ;;  %v647_v27 = vrot.slane %v1741_v21, 1  ;;  %v240_v13 = vld [vmem:[%s1708_s29 + $0x40] sm:$0xf]  ;;  %v241_v14 = vld [vmem:[%s1708_s29 + $0x44] sm:$0xf] }
  0x1b   : > { %v645_v22 = vor.u32 %v644_v16, %v643_v15  ;;  %v1750_v30 = vshll.u32 %v1738_v18, 16  ;;  %v1754_v33 = vshrl.u32 %v1738_v18, 16  ;;  %v314_v41 = vor.u32 %v1727_v9, %v310_v26 }
  0x1c   : > { %v303_v24 = vsel %vm291_vm1, %v298_v19, %v302_v12  ;;  %v649_v32 = vor.u32 %v648_v23, %v647_v27  ;;  %v311_v34 = vsel %vm291_vm1, %v306_v25, %v310_v26  ;;  %v318_v42 = vrot.slane %v1735_v17, 1 }
  0x1d   : > { %v365_v28 = vsel %vm360_vm3, %v303_v24, 0  ;;  %v646_v29 = vsel %vm639_vm2, %v642_v20, %v645_v22  ;;  %v651_v36 = vrot.slane %v1754_v33, 1  ;;  %v652_v37 = vrot.slane %v1750_v30, 2 }
  0x1e   : > { %1328 = vmatpush3.bf16.xpose.msra.mxu1 %v365_v28  ;;  %v689_v31 = vsel %vm360_vm3, %v646_v29, 0  ;;  %v650_v35 = vsel %vm639_vm2, %v645_v22, %v649_v32  ;;  %v368_v39 = vsel %vm360_vm3, %v311_v34, 0  ;;  %v1770_v44 = vshll.u32 %v1763_v38, 16 }
  0x1f   : > { %1408 = vmatpush3.bf16.xpose.msra.mxu0 %v689_v31  ;;  %1329 = vmatprep.subr.bf16.mxu1 %v1635_v0  ;;  %v692_v40 = vsel %vm360_vm3, %v650_v35, 0  ;;  %v653_v43 = vor.u32 %v652_v37, %v651_v36  ;;  %v1773_v45 = vshrl.u32 %v1763_v38, 16  ;;  %v319_v46 = vsel %vm291_vm1, %v314_v41, %v318_v42  ;;  %v242_v35 = vld [vmem:[%s1708_s29 + $0x48] sm:$0xf] }
  0x20   : > { %1409 = vmatprep.subr.bf16.mxu0 %v1635_v0  ;;  %v656_v49 = vrot.slane %v1770_v44, 2  ;;  %v371_v51 = vsel %vm360_vm3, %v319_v46, 0  ;;  %v322_v53 = vor.u32 %v1741_v21, %v318_v42  ;;  %v326_v54 = vrot.slane %v1750_v30, 1 }
  0x21   : > { %v654_v47 = vsel %vm639_vm2, %v649_v32, %v653_v43  ;;  %v655_v48 = vrot.slane %v1773_v45, 1  ;;  %v1789_v56 = vshll.u32 %v1782_v50, 16  ;;  %v1792_v57 = vshrl.u32 %v1782_v50, 16 }
  0x22   : > { %v695_v52 = vsel %vm360_vm3, %v654_v47, 0  ;;  %v327_v58 = vsel %vm291_vm1, %v322_v53, %v326_v54  ;;  %v330_v5 = vor.u32 %v1754_v33, %v326_v54  ;;  %v334_v6 = vrot.slane %v1770_v44, 1 }
  0x23   : > { %v657_v55 = vor.u32 %v656_v49, %v655_v48  ;;  %v659_v61 = vrot.slane %v1792_v57, 1  ;;  %v660_v62 = vrot.slane %v1789_v56, 2  ;;  %v374_v63 = vsel %vm360_vm3, %v327_v58, 0 }
  0x24   : > { %v1808_v7 = vshll.u32 %v1798_v59, 16  ;;  %v1811_v12 = vshrl.u32 %v1798_v59, 16  ;;  %v490_v15 = vrot.slane %v1711_v1, 1  ;;  %v491_v16 = vrot.slane %v1714_v2, 1 }
  0x25   : > { %v658_v60 = vsel %vm639_vm2, %v653_v43, %v657_v55  ;;  %v661_v11 = vor.u32 %v660_v62, %v659_v61  ;;  %v335_v19 = vsel %vm291_vm1, %v330_v5, %v334_v6  ;;  %v1823_v24 = vcombine.low %v240_v13, %v241_v14 }
  0x26   : > { %1330 = vmatpush3.bf16.xpose.msra.mxu1 %v368_v39  ;;  %v698_v4 = vsel %vm360_vm3, %v658_v60, 0  ;;  %v664_v20 = vrot.slane %v1808_v7, 2  ;;  %v663_v23 = vrot.slane %v1811_v12, 1  ;;  %v1828_v25 = vsel %vm489_vm4, %v490_v15, %v491_v16 }
  0x27   : > { %1410 = vmatpush3.bf16.xpose.msra.mxu0 %v692_v40  ;;  %1331 = vmatprep.subr.bf16.mxu1 %v1635_v0  ;;  %v662_v22 = vsel %vm639_vm2, %v657_v55, %v661_v11  ;;  %v377_v26 = vsel %vm360_vm3, %v335_v19, 0  ;;  %v338_v28 = vor.u32 %v1773_v45, %v334_v6  ;;  %v342_v29 = vrot.slane %v1789_v56, 1  ;;  %v243_v55 = vld [vmem:[%s1708_s29 + $0x4c] sm:$0xf] }
  0x28   : > { %1411 = vmatprep.subr.bf16.mxu0 %v1635_v0  ;;  %v701_v27 = vsel %vm360_vm3, %v662_v22, 0  ;;  %v665_v31 = vor.u32 %v664_v20, %v663_v23  ;;  %v668_v32 = vshrl.u32 %v1823_v24, 16  ;;  %v671_v34 = vshll.u32 %v1823_v24, 16 }
  0x29   : > { %v343_v36 = vsel %vm291_vm1, %v338_v28, %v342_v29  ;;  %v1845_v41 = vcombine.low %v242_v35, %v242_v35  ;;  %v346_v46 = vor.u32 %v1792_v57, %v342_v29  ;;  %v350_v47 = vrot.slane %v1808_v7, 1 }
  0x2a   : > { %v666_v37 = vsel %vm639_vm2, %v661_v11, %v665_v31  ;;  %v670_v39 = vrot.slane %v668_v32, 1  ;;  %v673_v40 = vrot.slane %v671_v34, 2  ;;  %v380_v42 = vsel %vm360_vm3, %v343_v36, 0 }
  0x2b   : > { %v704_v43 = vsel %vm360_vm3, %v666_v37, 0  ;;  %v1851_v48 = vcombine.low %v240_v13, %v240_v13  ;;  %v351_v53 = vsel %vm291_vm1, %v346_v46, %v350_v47  ;;  %v1861_v62 = vcombine.low %v242_v35, %v243_v55  ;;  %v1214_v37 = vld [vmem:[%s2192_s1 + $0x4] sm:$0xf] }
  0x2c   : > { %v674_v49 = vor.u32 %v673_v40, %v670_v39  ;;  %v354_v11 = vor.u32 %v1811_v12, %v350_v47  ;;  %v906_v29 = vrot.slane %v1727_v9, 2  ;;  %v909_v35 = vrot.slane %v1741_v21, 2  ;;  %v1232_v40 = vld [vmem:[%s2192_s1 + $0x10] sm:$0xf] }
  0x2d   : > { %v356_v54 = vshll.u32 %v1851_v48, 16  ;;  %v849_v5 = vrot.slane %v1861_v62, 2  ;;  %v910_v36 = vrot.slane %v1735_v17, 3  ;;  %v431_v39 = vsel %vm360_vm3, %v1711_v1, 0 }
  0x2e   : > { %1332 = vmatpush3.bf16.xpose.msra.mxu1 %v371_v51  ;;  %v677_v51 = vshrl.u32 %v1845_v41, 16  ;;  %v675_v58 = vsel %vm639_vm2, %v665_v31, %v674_v49  ;;  %v907_v31 = vrot.slane %v1724_v8, 3  ;;  %v759_v9 = vrot.slane %v1730_v10, 2 }
  0x2f   : > { %1412 = vmatpush3.bf16.xpose.msra.mxu0 %v695_v52  ;;  %1333 = vmatprep.subr.bf16.mxu1 %v1635_v0  ;;  %v680_v52 = vshll.u32 %v1845_v41, 16  ;;  %v707_v6 = vsel %vm360_vm3, %v675_v58, 0  ;;  %v358_v13 = vrot.slane %v356_v54, 1  ;;  %v433_v21 = vsel %vm360_vm3, %v1714_v2, 0 }
  0x30   : > { %1413 = vmatprep.subr.bf16.mxu0 %v1635_v0  ;;  %v679_v60 = vrot.slane %v677_v51, 1  ;;  %v761_v47 = vrot.slane %v1738_v18, 2  ;;  %v435_v51 = vsel %vm360_vm3, %v1717_v3, 0  ;;  %v437_v55 = vsel %vm360_vm3, %v1730_v10, 0 }
  0x31   : > { %v682_v61 = vrot.slane %v680_v52, 2  ;;  %v359_v19 = vsel %vm291_vm1, %v354_v11, %v358_v13  ;;  %v767_v11 = vrot.slane %v1798_v59, 2 }
  0x32   : > { %v386_v22 = vsel %vm360_vm3, %v359_v19, 0 }
  0x33   : > { %v683_v14 = vor.u32 %v682_v61, %v679_v60  ;;  %v765_v60 = vrot.slane %v1782_v50, 2 }
  0x35   : > { %v684_v20 = vsel %vm639_vm2, %v674_v49, %v683_v14  ;;  %v762_v49 = vsel %vm755_vm5, %v759_v9, %v761_v47  ;;  %v768_v13 = vsel %vm755_vm5, %v765_v60, %v767_v11  ;;  %v441_v14 = vsel %vm360_vm3, %v1763_v38, 0 }
  0x36   : > { %1334 = vmatpush3.bf16.xpose.msra.mxu1 %v374_v63  ;;  %v383_v63 = vsel %vm360_vm3, %v351_v53, 0  ;;  %v710_v23 = vsel %vm360_vm3, %v684_v20, 0  ;;  %v783_v52 = vsel %vm360_vm3, %v762_v49, 0  ;;  %v763_v53 = vrot.slane %v1763_v38, 2 }
  0x37   : > { %1414 = vmatpush3.bf16.xpose.msra.mxu0 %v698_v4  ;;  %1335 = vmatprep.subr.bf16.mxu1 %v1635_v0  ;;  %v1865_v4 = vrot.slane %v1823_v24, 2  ;;  %v792_v19 = vsel %vm360_vm3, %v768_v13, 0  ;;  %v1226_v13 = vld [vmem:[%s2192_s1 + $0x8] sm:$0xf] }
  0x38   : > { %1415 = vmatprep.subr.bf16.mxu0 %v1635_v0  ;;  %v764_v54 = vsel %vm755_vm5, %v761_v47, %v763_v53  ;;  %v766_v61 = vsel %vm755_vm5, %v763_v53, %v765_v60  ;;  %v2025_v53 = vld [vmem:[%s1708_s29 + $0x50] ss:$0 sps:$4 sm:$0xff]  }
  0x39   : > { %v1874_v15 = vsel %vm755_vm5, %v1865_v4, %v849_v5  ;;  %v786_v58 = vsel %vm360_vm3, %v764_v54, 0  ;;  %v770_v20 = vsel %vm755_vm5, %v767_v11, %v1865_v4  ;;  %v851_v60 = vrot.slane %v2025_v53, 2 }
  0x3a   : > { %v914_v11 = vrot.slane %v1750_v30, 3  ;;  %v1107_v30 = vld [vmem:[%s2193_s2] sm:$0xff] }
  0x3e   : > { %1336 = vmatpush3.bf16.xpose.msra.mxu1 %v377_v26  ;;  %v756_v26 = vrot.slane %v1714_v2, 2 }
  0x3f   : > { %1416 = vmatpush3.bf16.xpose.msra.mxu0 %v701_v27  ;;  %1337 = vmatprep.subr.bf16.mxu1 %v1635_v0  ;;  %v757_v27 = vrot.slane %v1717_v3, 2 }
  0x40   : > { %1417 = vmatprep.subr.bf16.mxu0 %v1635_v0 }
  0x41   : > { %v758_v28 = vsel %vm755_vm5, %v756_v26, %v757_v27  ;;  %v760_v1 = vsel %vm755_vm5, %v757_v27, %v759_v9  ;;  %v771_v26 = vrot.slane %v1845_v41, 2  ;;  %v499_v9 = vrot.slane %v1763_v38, 1 }
  0x42   : > { %v777_v8 = vsel %vm360_vm3, %v758_v28, 0  ;;  %v780_v46 = vsel %vm360_vm3, %v760_v1, 0  ;;  %v445_v28 = vsel %vm360_vm3, %v1798_v59, 0 }
  0x43   : > { %v772_v27 = vsel %vm755_vm5, %v1865_v4, %v771_v26  ;;  %v1234_v4 = vld [vmem:[%s2192_s1 + $0x14] sm:$0xf] }
  0x46   : > { %1338 = vmatpush3.bf16.xpose.msra.mxu1 %v380_v42  ;;  %v908_v42 = vor.u32 %v907_v31, %v906_v29  ;;  %v798_v29 = vsel %vm360_vm3, %v772_v27, 0  ;;  %v245_v31 = vld [vmem:[%s2192_s1] sm:$0xf] }
  0x47   : > { %1418 = vmatpush3.bf16.xpose.msra.mxu0 %v704_v43  ;;  %1339 = vmatprep.subr.bf16.mxu1 %v1635_v0  ;;  %v1899_v43 = vor.u32 %v910_v36, %v909_v35  ;;  %v511_v35 = vsel %vm360_vm3, %v1828_v25, 0  ;;  %v493_v36 = vrot.slane %v1717_v3, 1 }
  0x48   : > { %1419 = vmatprep.subr.bf16.mxu0 %v1635_v0 }
  0x49   : > { %v1906_v17 = vsel %vm905_vm6, %v908_v42, %v1899_v43  ;;  %v494_v25 = vsel %vm489_vm4, %v491_v16, %v493_v36 }
  0x4e   : > { %1340 = vmatpush3.bf16.xpose.msra.mxu1 %v383_v63  ;;  %v439_v63 = vsel %vm360_vm3, %v1738_v18, 0 }
  0x4f   : > { %1420 = vmatpush3.bf16.xpose.msra.mxu0 %v707_v6  ;;  %1341 = vmatprep.subr.bf16.mxu1 %v1635_v0  ;;  %v789_v6 = vsel %vm360_vm3, %v766_v61, 0 }
  0x50   : > { %1421 = vmatprep.subr.bf16.mxu0 %v1635_v0 }
  0x56   : > { %1342 = vmatpush3.bf16.xpose.msra.mxu1 %v386_v22  ;;  %v443_v22 = vsel %vm360_vm3, %v1782_v50, 0 }
  0x57   : > { %1422 = vmatpush3.bf16.xpose.msra.mxu0 %v710_v23  ;;  %1347 = vmatprep.subr.bf16.mxu1 %v1635_v0  ;;  %v795_v23 = vsel %vm360_vm3, %v770_v20, 0  ;;  %v918_v20 = vrot.slane %v1770_v44, 3 }
  0x58   : > { %1427 = vmatprep.subr.bf16.mxu0 %v1635_v0 }
  0x5d   : > { %1344 = vmatmul.mubr.msk.bf16.vlgmr.msra.gmra.mrb[0].mxu1 %vm360_vm3, %v1214_v37  ;;  %v514_v37 = vsel %vm360_vm3, %v494_v25, 0  ;;  %v929_v25 = vrot.slane %v668_v32, 2 }
  0x5e   : > { %1348 = vmatpush3.bf16.xpose.msra.mxu1 %v431_v39  ;;  %1424 = vmatmul.mubr.msk.bf16.vlgmr.msra.gmra.mrb[0].mxu0 %vm360_vm3, %v1232_v40  ;;  %v495_v39 = vrot.slane %v1730_v10, 1  ;;  %v497_v40 = vrot.slane %v1738_v18, 1 }
  0x5f   : > { %1428 = vmatpush3.bf16.xpose.msra.mxu0 %v777_v8  ;;  %1349 = vmatprep.subr.bf16.mxu1 %v1635_v0 }
  0x60   : > { %1429 = vmatprep.subr.bf16.mxu0 %v1635_v0  ;;  %1363 = vmatprep.mubr.msk.bf16.mxu1 %vm1636_vm0, %v1635_v0  ;;  %v496_v2 = vsel %vm489_vm4, %v493_v36, %v495_v39  ;;  %v498_v42 = vsel %vm489_vm4, %v495_v39, %v497_v40  ;;  %v500_v1 = vsel %vm489_vm4, %v497_v40, %v499_v9  ;;  %v934_v39 = vshrl.u32 %v1861_v62, 16 }
  0x61   : > { %1443 = vmatprep.mubr.msk.bf16.mxu0 %vm1636_vm0, %v1635_v0  ;;  %v1990_v16 = vsel %vm360_vm3, %v496_v2, 0  ;;  %v1998_v8 = vsel %vm360_vm3, %v498_v42, 0  ;;  %v937_v2 = vshll.u32 %v1861_v62, 16  ;;  %v583_v42 = vrot.slane %v1823_v24, 1 }
  0x62   : > { %v936_v32 = vrot.slane %v934_v39, 2 }
  0x63   : > { %v939_v40 = vrot.slane %v937_v2, 3 }
  0x66   : > { %1350 = vmatpush3.bf16.xpose.msra.mxu1 %v433_v21  ;;  %v2006_v21 = vsel %vm360_vm3, %v500_v1, 0  ;;  %v946_v1 = vshll.u32 %v2025_v53, 16 }
  0x67   : > { %1430 = vmatpush3.bf16.xpose.msra.mxu0 %v780_v46  ;;  %1351 = vmatprep.subr.bf16.mxu1 %v1635_v0 }
  0x68   : > { %1431 = vmatprep.subr.bf16.mxu0 %v1635_v0 }
  0x6e   : > { %1352 = vmatpush3.bf16.xpose.msra.mxu1 %v435_v51  ;;  %v2017_v51 = vrot.slane %v1798_v59, 1 }
  0x6f   : > { %1432 = vmatpush3.bf16.xpose.msra.mxu0 %v783_v52  ;;  %1353 = vmatprep.subr.bf16.mxu1 %v1635_v0 }
  0x70   : > { %1433 = vmatprep.subr.bf16.mxu0 %v1635_v0 }
  0x76   : > { %1354 = vmatpush3.bf16.xpose.msra.mxu1 %v437_v55  ;;  %v857_v55 = vsel %vm360_vm3, %v1874_v15, 0 }
  0x77   : > { %1434 = vmatpush3.bf16.xpose.msra.mxu0 %v786_v58  ;;  %1355 = vmatprep.subr.bf16.mxu1 %v1635_v0 }
  0x78   : > { %1435 = vmatprep.subr.bf16.mxu0 %v1635_v0 }
  0x7e   : > { %1356 = vmatpush3.bf16.xpose.msra.mxu1 %v439_v63  ;;  %v852_v63 = vsel %vm755_vm5, %v849_v5, %v851_v60  ;;  %v1236_v5 = vld [vmem:[%s2192_s1 + $0x18] sm:$0xf] }
  0x7f   : > { %1436 = vmatpush3.bf16.xpose.msra.mxu0 %v789_v6  ;;  %1357 = vmatprep.subr.bf16.mxu1 %v1635_v0 }
  0x80   : > { %1437 = vmatprep.subr.bf16.mxu0 %v1635_v0 }
  0x86   : > { %1358 = vmatpush3.bf16.xpose.msra.mxu1 %v441_v14  ;;  %v955_v14 = vsel %vm360_vm3, %v1906_v17, 0  ;;  %v917_v17 = vrot.slane %v1773_v45, 2  ;;  %v921_v45 = vrot.slane %v1792_v57, 2 }
  0x87   : > { %1438 = vmatpush3.bf16.xpose.msra.mxu0 %v792_v19  ;;  %1359 = vmatprep.subr.bf16.mxu1 %v1635_v0 }
  0x88   : > { %1439 = vmatprep.subr.bf16.mxu0 %v1635_v0  ;;  %v919_v27 = vor.u32 %v918_v20, %v917_v17  ;;  %v1031_v20 = vrot.slane %v1798_v59, 3 }
  0x8e   : > { %1360 = vmatpush3.bf16.xpose.msra.mxu1 %v443_v22  ;;  %v1637_v22 = vmov 0  }
  0x8f   : > { %1440 = vmatpush3.bf16.xpose.msra.mxu0 %v795_v23  ;;  %1361 = vmatprep.subr.bf16.mxu1 %v1635_v0 }
  0x90   : > { %1441 = vmatprep.subr.bf16.mxu0 %v1635_v0  ;;  %1581 = vset.pattern.permute.xlu0 %v1637_v22 }
  0x91   : > { %1110 = vperm.xlu0 %1581, %v1107_v30   ;;  %v1029_v30 = vrot.slane %v1782_v50, 3 }
  0x96   : > { %1362 = vmatpush3.bf16.xpose.msra.mxu1 %v445_v28 }
  0x97   : > { %1442 = vmatpush3.bf16.xpose.msra.mxu0 %v798_v29  ;;  %1367 = vmatprep.subr.bf16.mxu1 %v1635_v0 }
  0x98   : > { %1447 = vmatprep.subr.bf16.mxu0 %v1635_v0 }
  0x9d   : > { %1364 = vmatmul.mubr.msk.bf16.vlgmr.msra.gmra.mrb[0].mxu1 %vm360_vm3, %v245_v31 }
  0x9e   : > { %1368 = vmatpush3.bf16.xpose.msra.mxu1 %v511_v35  ;;  %1444 = vmatmul.mubr.msk.bf16.vlgmr.msra.gmra.mrb[0].mxu0 %vm360_vm3, %v1234_v4  ;;  %v925_v35 = vrot.slane %v1811_v12, 2  ;;  %v926_v4 = vrot.slane %v1808_v7, 3  ;;  %v930_v12 = vrot.slane %v671_v34, 3 }
  0x9f   : > { %1448 = vmatpush3.bf16.xpose.msra.mxu0 %v780_v46  ;;  %1369 = vmatprep.subr.bf16.mxu1 %v1635_v0  ;;  %v501_v46 = vrot.slane %v1782_v50, 1 }
  0xa0   : > { %1449 = vmatprep.subr.bf16.mxu0 %v1635_v0  ;;  %1383 = vmatprep.mubr.msk.bf16.mxu1 %vm1636_vm0, %v1635_v0  ;;  %v927_v36 = vor.u32 %v926_v4, %v925_v35 }
  0xa1   : > { %1463 = vmatprep.mubr.msk.bf16.mxu0 %vm1636_vm0, %v1635_v0  ;;  %v502_v47 = vsel %vm489_vm4, %v499_v9, %v501_v46  ;;  %v943_v9 = vshrl.u32 %v2025_v53, 16 }
  0xa2   : > { %v2014_v49 = vsel %vm360_vm3, %v502_v47, 0 }
  0xa3   : > { %v945_v47 = vrot.slane %v943_v9, 2 }
  0xa6   : > { %1370 = vmatpush3.bf16.xpose.msra.mxu1 %v514_v37 }
  0xa7   : > { %1450 = vmatpush3.bf16.xpose.msra.mxu0 %v783_v52  ;;  %1371 = vmatprep.subr.bf16.mxu1 %v1635_v0  ;;  %v504_v52 = vsel %vm489_vm4, %v501_v46, %v2017_v51 }
  0xa8   : > { %1451 = vmatprep.subr.bf16.mxu0 %v1635_v0  ;;  %v2028_v54 = vsel %vm360_vm3, %v504_v52, 0 }
  0xae   : > { %1372 = vmatpush3.bf16.xpose.msra.mxu1 %v1990_v16 }
  0xaf   : > { %1452 = vmatpush3.bf16.xpose.msra.mxu0 %v786_v58  ;;  %1373 = vmatprep.subr.bf16.mxu1 %v1635_v0  ;;  %v505_v58 = vrot.slane %v1851_v48, 1  ;;  %v860_v48 = vsel %vm360_vm3, %v852_v63, 0 }
  0xb0   : > { %1453 = vmatprep.subr.bf16.mxu0 %v1635_v0 }
  0xb1   : > { %v506_v61 = vsel %vm489_vm4, %v2017_v51, %v505_v58  ;;  %v585_v58 = vrot.slane %v1845_v41, 1 }
  0xb2   : > { %v532_v15 = vsel %vm360_vm3, %v506_v61, 0 }
  0xb6   : > { %1374 = vmatpush3.bf16.xpose.msra.mxu1 %v1998_v8 }
  0xb7   : > { %1454 = vmatpush3.bf16.xpose.msra.mxu0 %v789_v6  ;;  %1375 = vmatprep.subr.bf16.mxu1 %v1635_v0  ;;  %v913_v6 = vrot.slane %v1754_v33, 2 }
  0xb8   : > { %1455 = vmatprep.subr.bf16.mxu0 %v1635_v0 }
  0xbe   : > { %1376 = vmatpush3.bf16.xpose.msra.mxu1 %v2006_v21 }
  0xbf   : > { %1456 = vmatpush3.bf16.xpose.msra.mxu0 %v792_v19  ;;  %1377 = vmatprep.subr.bf16.mxu1 %v1635_v0  ;;  %v915_v19 = vor.u32 %v914_v11, %v913_v6  ;;  %v1228_v6 = vld [vmem:[%s2192_s1 + $0xc] sm:$0xf]  ;;  %v1240_v11 = vld [vmem:[%s2192_s1 + $0x1c] sm:$0xf] }
  0xc0   : > { %1457 = vmatprep.subr.bf16.mxu0 %v1635_v0 }
  0xc1   : > { %v916_v33 = vsel %vm905_vm6, %v1899_v43, %v915_v19  ;;  %v920_v44 = vsel %vm905_vm6, %v915_v19, %v919_v27  ;;  %v922_v43 = vrot.slane %v1789_v56, 3 }
  0xc2   : > { %v958_v26 = vsel %vm360_vm3, %v916_v33, 0  ;;  %v961_v28 = vsel %vm360_vm3, %v920_v44, 0 }
  0xc3   : > { %v923_v29 = vor.u32 %v922_v43, %v921_v45 }
  0xc5   : > { %v924_v31 = vsel %vm905_vm6, %v919_v27, %v923_v29  ;;  %v928_v56 = vsel %vm905_vm6, %v923_v29, %v927_v36  ;;  %v1035_v27 = vrot.slane %v1861_v62, 3  ;;  %v1242_v62 = vld [vmem:[%s2192_s1 + $0x20] sm:$0xf] }
  0xc6   : > { %1378 = vmatpush3.bf16.xpose.msra.mxu1 %v2014_v49  ;;  %v964_v57 = vsel %vm360_vm3, %v924_v31, 0  ;;  %v967_v7 = vsel %vm360_vm3, %v928_v56, 0 }
  0xc7   : > { %1458 = vmatpush3.bf16.xpose.msra.mxu0 %v795_v23  ;;  %1379 = vmatprep.subr.bf16.mxu1 %v1635_v0  ;;  %v1114_v23 = vld [vmem:[%s2194_s3] sm:$0xff] }
  0xc8   : > { %1459 = vmatprep.subr.bf16.mxu0 %v1635_v0  ;;  %1117 = vperm.xlu0 %1581, %v1114_v23   ;;  %v1033_v23 = vrot.slane %v1823_v24, 3  ;;  %v1037_v24 = vrot.slane %v2025_v53, 3 }
  0xca   : > { %v1034_v50 = vsel %vm1021_vm7, %v1031_v20, %v1033_v23  ;;  %v1036_v59 = vsel %vm1021_vm7, %v1033_v23, %v1035_v27  ;;  %v1038_v45 = vsel %vm1021_vm7, %v1035_v27, %v1037_v24 }
  0xcb   : > { %v1061_v44 = vsel %vm360_vm3, %v1036_v59, 0  ;;  %v1064_v43 = vsel %vm360_vm3, %v1038_v45, 0 }
  0xce   : > { %1380 = vmatpush3.bf16.xpose.msra.mxu1 %v2028_v54 }
  0xcf   : > { %1460 = vmatpush3.bf16.xpose.msra.mxu0 %v857_v55  ;;  %1381 = vmatprep.subr.bf16.mxu1 %v1635_v0 }
  0xd0   : > { %1461 = vmatprep.subr.bf16.mxu0 %v1635_v0 }
  0xd6   : > { %1382 = vmatpush3.bf16.xpose.msra.mxu1 %v532_v15  ;;  %v1022_v15 = vrot.slane %v1717_v3, 3  ;;  %v1025_v3 = vrot.slane %v1738_v18, 3 }
  0xd7   : > { %1462 = vmatpush3.bf16.xpose.msra.mxu0 %v860_v48  ;;  %1387 = vmatprep.subr.bf16.mxu1 %v1635_v0  ;;  %v1023_v48 = vrot.slane %v1730_v10, 3 }
  0xd8   : > { %1467 = vmatprep.subr.bf16.mxu0 %v1635_v0 }
  0xd9   : > { %v1024_v41 = vsel %vm1021_vm7, %v1022_v15, %v1023_v48  ;;  %v1026_v10 = vsel %vm1021_vm7, %v1023_v48, %v1025_v3 }
  0xdd   : > { %1384 = vmatmul.mubr.msk.bf16.vlgmr.msra.gmra.mrb[0].mxu1 %vm360_vm3, %v1226_v13  ;;  %v1043_v13 = vsel %vm360_vm3, %v1024_v41, 0 }
  0xde   : > { %1388 = vmatpush3.bf16.xpose.msra.mxu1 %v514_v37  ;;  %1464 = vmatmul.mubr.msk.bf16.vlgmr.msra.gmra.mrb[0].mxu0 %vm360_vm3, %v1236_v5  ;;  %v931_v37 = vor.u32 %v930_v12, %v929_v25  ;;  %v1046_v5 = vsel %vm360_vm3, %v1026_v10, 0 }
  0xdf   : > { %1468 = vmatpush3.bf16.xpose.msra.mxu0 %v955_v14  ;;  %1389 = vmatprep.subr.bf16.mxu1 %v1635_v0  ;;  %v1027_v14 = vrot.slane %v1763_v38, 3  ;;  %v1032_v38 = vsel %vm1021_vm7, %v1029_v30, %v1031_v20 }
  0xe0   : > { %1469 = vmatprep.subr.bf16.mxu0 %v1635_v0  ;;  %1403 = vmatprep.mubr.msk.bf16.mxu1 %vm1636_vm0, %v1635_v0  ;;  %v1055_v22 = vsel %vm360_vm3, %v1032_v38, 0 }
  0xe1   : > { %1483 = vmatprep.mubr.msk.bf16.mxu0 %vm1636_vm0, %v1635_v0  ;;  %v1028_v19 = vsel %vm1021_vm7, %v1025_v3, %v1027_v14  ;;  %v1030_v33 = vsel %vm1021_vm7, %v1027_v14, %v1029_v30 }
  0xe2   : > { %v1049_v18 = vsel %vm360_vm3, %v1028_v19, 0  ;;  %v1052_v17 = vsel %vm360_vm3, %v1030_v33, 0 }
  0xe6   : > { %1390 = vmatpush3.bf16.xpose.msra.mxu1 %v1990_v16  ;;  %v932_v16 = vsel %vm905_vm6, %v927_v36, %v931_v37 }
  0xe7   : > { %1470 = vmatpush3.bf16.xpose.msra.mxu0 %v958_v26  ;;  %1391 = vmatprep.subr.bf16.mxu1 %v1635_v0  ;;  %v970_v34 = vsel %vm360_vm3, %v932_v16, 0  ;;  %v1058_v26 = vsel %vm360_vm3, %v1034_v50, 0 }
  0xe8   : > { %1471 = vmatprep.subr.bf16.mxu0 %v1635_v0 }
  0xee   : > { %1392 = vmatpush3.bf16.xpose.msra.mxu1 %v1998_v8  ;;  %v940_v8 = vor.u32 %v939_v40, %v936_v32 }
  0xef   : > { %1472 = vmatpush3.bf16.xpose.msra.mxu0 %v961_v28  ;;  %1393 = vmatprep.subr.bf16.mxu1 %v1635_v0 }
  0xf0   : > { %1473 = vmatprep.subr.bf16.mxu0 %v1635_v0  ;;  %v941_v46 = vsel %vm905_vm6, %v931_v37, %v940_v8 }
  0xf1   : > { %v973_v55 = vsel %vm360_vm3, %v941_v46, 0 }
  0xf6   : > { %1394 = vmatpush3.bf16.xpose.msra.mxu1 %v2006_v21  ;;  %v584_v21 = vsel %vm489_vm4, %v2017_v51, %v583_v42 }
  0xf7   : > { %1474 = vmatpush3.bf16.xpose.msra.mxu0 %v964_v57  ;;  %1395 = vmatprep.subr.bf16.mxu1 %v1635_v0  ;;  %v591_v52 = vsel %vm360_vm3, %v584_v21, 0 }
  0xf8   : > { %1475 = vmatprep.subr.bf16.mxu0 %v1635_v0 }
  0xfe   : > { %1396 = vmatpush3.bf16.xpose.msra.mxu1 %v2014_v49  ;;  %v948_v49 = vrot.slane %v946_v1, 3 }
  0xff   : > { %1476 = vmatpush3.bf16.xpose.msra.mxu0 %v967_v7  ;;  %1397 = vmatprep.subr.bf16.mxu1 %v1635_v0 }
 0x100   : > { %1477 = vmatprep.subr.bf16.mxu0 %v1635_v0  ;;  %v949_v60 = vor.u32 %v948_v49, %v945_v47 }
 0x102   : > { %v950_v51 = vsel %vm905_vm6, %v940_v8, %v949_v60 }
 0x103   : > { %v976_v63 = vsel %vm360_vm3, %v950_v51, 0 }
 0x106   : > { %1398 = vmatpush3.bf16.xpose.msra.mxu1 %v2028_v54  ;;  %v586_v54 = vsel %vm489_vm4, %v583_v42, %v585_v58 }
 0x107   : > { %1478 = vmatpush3.bf16.xpose.msra.mxu0 %v970_v34  ;;  %1399 = vmatprep.subr.bf16.mxu1 %v1635_v0  ;;  %v594_v61 = vsel %vm360_vm3, %v586_v54, 0 }
 0x108   : > { %1479 = vmatprep.subr.bf16.mxu0 %v1635_v0 }
 0x10e   : > { %1400 = vmatpush3.bf16.xpose.msra.mxu1 %v591_v52 }
 0x10f   : > { %1480 = vmatpush3.bf16.xpose.msra.mxu0 %v973_v55  ;;  %1401 = vmatprep.subr.bf16.mxu1 %v1635_v0 }
 0x110   : > { %1481 = vmatprep.subr.bf16.mxu0 %v1635_v0  ;;  %v1111_v53 = vpop.permute.xlu0 %1110 }
 0x116   : > { %1402 = vmatpush3.bf16.xpose.msra.mxu1 %v594_v61 }
 0x117   : > { %1482 = vmatpush3.bf16.xpose.msra.mxu0 %v976_v63 }
 0x118   : > { %1487 = vmatprep.subr.bf16.mxu0 %v1635_v0 }
 0x11d   : > { %1404 = vmatmul.mubr.msk.bf16.vlgmr.msra.gmra.mrb[0].mxu1 %vm360_vm3, %v1228_v6 }
 0x11e   : > { %1484 = vmatmul.mubr.msk.bf16.vlgmr.msra.gmra.mrb[0].mxu0 %vm360_vm3, %v1240_v11 }
 0x11f   : > { %1488 = vmatpush3.bf16.xpose.msra.mxu0 %v1043_v13  ;;  %1503 = vmatprep.mubr.msk.bf16.mxu0 %vm1636_vm0, %v1635_v0 }
 0x120   : > { %1489 = vmatprep.subr.bf16.mxu0 %v1635_v0 }
 0x127   : > { %1490 = vmatpush3.bf16.xpose.msra.mxu0 %v1046_v5 }
 0x128   : > { %1491 = vmatprep.subr.bf16.mxu0 %v1635_v0 }
 0x12f   : > { %1492 = vmatpush3.bf16.xpose.msra.mxu0 %v1049_v18 }
 0x130   : > { %1493 = vmatprep.subr.bf16.mxu0 %v1635_v0 }
 0x137   : > { %1494 = vmatpush3.bf16.xpose.msra.mxu0 %v1052_v17 }
 0x138   : > { %1495 = vmatprep.subr.bf16.mxu0 %v1635_v0 }
 0x13f   : > { %1496 = vmatpush3.bf16.xpose.msra.mxu0 %v1055_v22 }
 0x140   : > { %1497 = vmatprep.subr.bf16.mxu0 %v1635_v0 }
 0x147   : > { %1498 = vmatpush3.bf16.xpose.msra.mxu0 %v1058_v26  ;;  %v1118_v12 = vpop.permute.xlu0 %1117 }
 0x148   : > { %1499 = vmatprep.subr.bf16.mxu0 %v1635_v0 }
 0x14f   : > { %1500 = vmatpush3.bf16.xpose.msra.mxu0 %v1061_v44 }
 0x150   : > { %1501 = vmatprep.subr.bf16.mxu0 %v1635_v0 }
 0x157   : > { %1502 = vmatpush3.bf16.xpose.msra.mxu0 %v1064_v43 }
 0x15e   : > { %1504 = vmatmul.mubr.msk.bf16.vlgmr.msra.gmra.mrb[0].mxu0 %vm360_vm3, %v1242_v62 }
 0x1f0   : > { %v630_v28 = vpop.f32.mrb[0].mxu1 }
 0x1f1   : > { %v1405_v29 = vpop.f32.mrb[1].mxu1 }
 0x1f2   : > { %v633_v31 = vpop.f32.mrb[2].mxu1 }
 0x1f3   : > { %v1406_v35 = vpop.f32.mrb[3].mxu1 }
 0x231   : > { %v1100_v0 = vpop.f32.mrb[0].mxu0 }
 0x232   : > { %v1507_v4 = vadd.f32 %v1100_v0, %v630_v28  ;;  %v1505_v57 = vpop.f32.mrb[1].mxu0 }
 0x233   : > { %v1103_v36 = vpop.f32.mrb[2].mxu0 }
 0x234   : > { %v1113_v56 = vmul.f32 %v1507_v4, %v1111_v53  ;;  %v1506_v25 = vpop.f32.mrb[3].mxu0 }
 0x236   : > { %v1120_v7 = vadd.f32 %v1118_v12, %v1113_v56 }
 0x238   : > { %v1121_v37 = vmax.f32 %v1120_v7, 0.0 }
 0x23a   : > { %1122 = vst [vmem:[%s217_s12] sm:$0xff] %v1121_v37 }
 0x23b PF: > { %s14_s19 = sadd.s32 1, %s1633_s19   ;;  %s2196_s15 = smov %s1625_s17 }
 0x23c   : > { %p11_p7 = scmp.ge.s32.totalorder %s14_s19, 8   ;;  %s2197_s16 = smov %s1629_s18 }
 0x23d   : > { %s2198_s17 = smov %s2201_s20  ;;  %s2199_s18 = smov %s2205_s21 }
 0x23e   :  { %13 = sbr.rel (!%p11_p7) target bundleno = 3 (0x3), region = 75 }

// kernel: basic_conv2d.2
= control target key start
LH: loop header
LB: loop body
LE: loop exit
PB: predicated region body
PF: predicated region fallthrough
CT: control target
= control target key end

     0   :  { %s1714_s15 = smov 0   ;;  %s1716_s16 = smov 0   ;;  %s2257_s0 = inlined_call_operand.vmem [shape: bf16[2,424,8], index: 0, kind: input, shape index: {}]   ;;  %s2258_s1 = inlined_call_operand.vmem [shape: bf16[9,8,8], index: 1, kind: input, shape index: {}]   ;;  %s2259_s2 = inlined_call_operand.vmem [shape: f32[1,384], index: 2, kind: input, shape index: {}]   ;;  %s2260_s3 = inlined_call_operand.vmem [shape: f32[2,8,1], index: 3, kind: output, shape index: {0}]   ;;  %s2261_s4 = inlined_call_operand.vmem [shape: f32[2,8,1], index: 4, kind: output, shape index: {1}]  }
   0x1   :  { %s1718_s17 = smov 0   ;;  %s1720_s18 = smov 0  }
   0x2   :  { %s1722_s19 = smov 0  }
   0x3 LB: > { %s24_s20 = sadd.s32 1, %s1676_s17  ;;  %s27_s21 = sadd.s32 1, %s1680_s18  ;;  %s1684_s19 = sphi %s1722_s19, %s15_s19   ;;  %s1680_s18 = sphi %s1720_s18, %s2265_s18   ;;  %s1676_s17 = sphi %s1718_s17, %s2264_s17   ;;  %s1672_s16 = sphi %s1716_s16, %s2263_s16   ;;  %s1668_s15 = sphi %s1714_s15, %s2262_s15  }
   0x4   : > { %p25_p0 = scmp.ge.s32.totalorder %s24_s20, 3  ;;  %p1259_p1 = scmp.ge.s32.totalorder %s1684_s19, 1 }
   0x5   : > { %p185_p2 = scmp.lt.s32.totalorder %s1684_s19, 7 }
   0x6   : > { %s2267_s20 = smov (%p25_p0, %s24_s20), 0  ;;  %s2269_s21 = smov (!%p25_p0, %s27_s21), %s1680_s18 }
   0x7   : > { %p186_p3 = pnand %p1259_p1, %p185_p2  ;;  %p29_p4 = scmp.ge.s32.totalorder %s2269_s21, 2 }
   0x8   : > { %p217_p5 = scmp.lt.s32.totalorder (!%p186_p3), %s1672_s16, 1  ;;  %p222_p6 = scmp.lt.s32.totalorder (!%p186_p3), %s1668_s15, 2 }
   0x9   : > { %s2271_s21 = smov (%p29_p4, %s2269_s21), 0  ;;  %189 = sbr.rel (%p186_p3) target bundleno = 721 (0x2d1), region = 32 }
   0xa   : > { %p1263_p7 = scmp.ne.s32.totalorder (!%p186_p3), %s1668_s15, 0 }
  0x10   : > { %s2273_s16 = smov (!%p217_p5, %s1672_s16), 1  ;;  %237 = sbr.rel (%p1263_p7) target bundleno = 23 (0x17), region = 36 }
  0x11   : > { %s1748_s22 = scalar_select %p222_p6, %s1668_s15, 2 }
  0x12   : > { %s1589_s23 = smul.u32 212, %s2273_s16  ;;  %s1261_s24 = sshll.u32 %s2273_s16, 3  ;;  %vm238_vm0 = vcmask (!%p1263_p7), 7168   ;;  %v1686_v0 = vmov (!%p1263_p7), 0.0  }
  0x13   : > { %s224_s27 = scalar_lea.vmem %s2259_s2, %s1748_s22  ;;  %s1757_s30 = scalar_lea.vmem %s2260_s3, %s1261_s24 }
  0x14   : > { %s221_s7 = scalar_lea.vmem %s2257_s0, %s1589_s23  ;;  %s1765_s10 = scalar_lea.vmem %s2261_s4, %s1261_s24  ;;  %239 = vst.msk [vmem:[%s1757_s30] sm:$0xff] (!%p1263_p7), %vm238_vm0, %v1686_v0 }
  0x15   : > { %240 = vst.msk [vmem:[%s1765_s10] sm:$0xff] (!%p1263_p7), %vm238_vm0, %v1686_v0 }
  0x17 PF: > { %s1264_s11 = sshll.u32 %s1668_s15, 7  ;;  %v1687_v1 = vmov 0.0   ;;  %vm1688_vm1 = vmmov 0   ;;  %vm313_vm2 = vsmask.f32 7424  ;;  %vm382_vm4 = vcmask 64512  }
  0x18   : > { %1380 = vmatprep.subr.bf16.mxu1 %v1687_v1  ;;  %1460 = vmatprep.subr.bf16.mxu0 %v1687_v1  ;;  %s242_s12 = sshra.s32 %s1264_s11, 3  ;;  %vm661_vm3 = vsmask.f32 6400  ;;  %vm511_vm5 = vcmask 1046528   ;;  %vm777_vm6 = vcmask 1045504   ;;  %vm1043_vm8 = vcmask 1044480  }
  0x19   : > { %s1265_s13 = sshll.u32 %s242_s12, 2  ;;  %1396 = vmatprep.mubr.msk.bf16.mxu1 %vm1688_vm1, %v1687_v1  ;;  %1476 = vmatprep.mubr.msk.bf16.mxu0 %vm1688_vm1, %v1687_v1  ;;  %vm927_vm7 = vsmask.f32 5376  ;;  %vm1141_vm9 = vcmask 7168  }
  0x1a   : > { %s1777_s14 = scalar_lea.vmem %s221_s7, %s1265_s13 }
  0x1b   : > { %v1780_v2 = vld [vmem:[%s1777_s14] sm:$0xff]   ;;  %v1783_v3 = vld [vmem:[%s1777_s14 + $0x8] sm:$0xff]   ;;  %v1786_v4 = vld [vmem:[%s1777_s14 + $0x10] sm:$0xff]  }
  0x1c   : > { %v315_v5 = vshrl.u32 %v1780_v2, 16  ;;  %v317_v6 = vshll.u32 %v1780_v2, 16  ;;  %v322_v7 = vshll.u32 %v1783_v3, 16  ;;  %v326_v8 = vshrl.u32 %v1783_v3, 16  ;;  %v1799_v11 = vld [vmem:[%s1777_s14 + $0x18] sm:$0xff]   ;;  %v1807_v19 = vld [vmem:[%s1777_s14 + $0x20] sm:$0xff]  }
  0x1d   : > { %v1793_v9 = vshll.u32 %v1786_v4, 16  ;;  %v1796_v10 = vshrl.u32 %v1786_v4, 16  ;;  %v1804_v18 = vshll.u32 %v1799_v11, 16  ;;  %v1810_v22 = vshrl.u32 %v1799_v11, 16  ;;  %v1832_v39 = vld [vmem:[%s1777_s14 + $0x28] sm:$0xff]   ;;  %v1851_v51 = vld [vmem:[%s1777_s14 + $0x30] sm:$0xff]  }
  0x1e   : > { %v319_v12 = vrot.slane %v317_v6, 1  ;;  %v324_v13 = vrot.slane %v322_v7, 1  ;;  %v662_v14 = vrot.slane %v326_v8, 1  ;;  %v663_v15 = vrot.slane %v322_v7, 2  ;;  %v1867_v60 = vld [vmem:[%s1777_s14 + $0x38] sm:$0xff]  }
  0x1f   : > { %v665_v16 = vrot.slane %v1796_v10, 1  ;;  %v666_v17 = vrot.slane %v1793_v9, 2  ;;  %v670_v24 = vrot.slane %v1804_v18, 2  ;;  %v332_v27 = vrot.slane %v1793_v9, 1 }
  0x20   : > { %v320_v20 = vor.u32 %v319_v12, %v315_v5  ;;  %v664_v21 = vor.u32 %v663_v15, %v662_v14  ;;  %v328_v26 = vor.u32 %v326_v8, %v324_v13  ;;  %v669_v28 = vrot.slane %v1810_v22, 1  ;;  %v262_v14 = vld [vmem:[%s1777_s14 + $0x40] sm:$0xf]  ;;  %v263_v15 = vld [vmem:[%s1777_s14 + $0x44] sm:$0xf] }
  0x21   : > { %v667_v23 = vor.u32 %v666_v17, %v665_v16  ;;  %v1819_v31 = vshll.u32 %v1807_v19, 16  ;;  %v1823_v34 = vshrl.u32 %v1807_v19, 16  ;;  %v336_v42 = vor.u32 %v1796_v10, %v332_v27 }
  0x22   : > { %v325_v25 = vsel %vm313_vm2, %v320_v20, %v324_v13  ;;  %v671_v33 = vor.u32 %v670_v24, %v669_v28  ;;  %v333_v35 = vsel %vm313_vm2, %v328_v26, %v332_v27  ;;  %v340_v43 = vrot.slane %v1804_v18, 1 }
  0x23   : > { %v387_v29 = vsel %vm382_vm4, %v325_v25, 0  ;;  %v668_v30 = vsel %vm661_vm3, %v664_v21, %v667_v23  ;;  %v673_v37 = vrot.slane %v1823_v34, 1  ;;  %v674_v38 = vrot.slane %v1819_v31, 2 }
  0x24   : > { %1381 = vmatpush3.bf16.xpose.msra.mxu1 %v387_v29  ;;  %v711_v32 = vsel %vm382_vm4, %v668_v30, 0  ;;  %v672_v36 = vsel %vm661_vm3, %v667_v23, %v671_v33  ;;  %v390_v40 = vsel %vm382_vm4, %v333_v35, 0  ;;  %v1839_v45 = vshll.u32 %v1832_v39, 16 }
  0x25   : > { %1461 = vmatpush3.bf16.xpose.msra.mxu0 %v711_v32  ;;  %1382 = vmatprep.subr.bf16.mxu1 %v1687_v1  ;;  %v714_v41 = vsel %vm382_vm4, %v672_v36, 0  ;;  %v675_v44 = vor.u32 %v674_v38, %v673_v37  ;;  %v1842_v46 = vshrl.u32 %v1832_v39, 16  ;;  %v341_v47 = vsel %vm313_vm2, %v336_v42, %v340_v43  ;;  %v264_v36 = vld [vmem:[%s1777_s14 + $0x48] sm:$0xf] }
  0x26   : > { %1462 = vmatprep.subr.bf16.mxu0 %v1687_v1  ;;  %v678_v50 = vrot.slane %v1839_v45, 2  ;;  %v393_v52 = vsel %vm382_vm4, %v341_v47, 0  ;;  %v344_v54 = vor.u32 %v1810_v22, %v340_v43  ;;  %v348_v55 = vrot.slane %v1819_v31, 1 }
  0x27   : > { %v676_v48 = vsel %vm661_vm3, %v671_v33, %v675_v44  ;;  %v677_v49 = vrot.slane %v1842_v46, 1  ;;  %v1858_v57 = vshll.u32 %v1851_v51, 16  ;;  %v1861_v58 = vshrl.u32 %v1851_v51, 16 }
  0x28   : > { %v717_v53 = vsel %vm382_vm4, %v676_v48, 0  ;;  %v349_v59 = vsel %vm313_vm2, %v344_v54, %v348_v55  ;;  %v352_v6 = vor.u32 %v1823_v34, %v348_v55  ;;  %v356_v7 = vrot.slane %v1839_v45, 1 }
  0x29   : > { %v679_v56 = vor.u32 %v678_v50, %v677_v49  ;;  %v681_v62 = vrot.slane %v1861_v58, 1  ;;  %v682_v63 = vrot.slane %v1858_v57, 2  ;;  %v396_v0 = vsel %vm382_vm4, %v349_v59, 0 }
  0x2a   : > { %v1877_v8 = vshll.u32 %v1867_v60, 16  ;;  %v1880_v13 = vshrl.u32 %v1867_v60, 16  ;;  %v512_v16 = vrot.slane %v1780_v2, 1  ;;  %v513_v17 = vrot.slane %v1783_v3, 1 }
  0x2b   : > { %v680_v61 = vsel %vm661_vm3, %v675_v44, %v679_v56  ;;  %v683_v12 = vor.u32 %v682_v63, %v681_v62  ;;  %v357_v20 = vsel %vm313_vm2, %v352_v6, %v356_v7  ;;  %v1892_v25 = vcombine.low %v262_v14, %v263_v15 }
  0x2c   : > { %1383 = vmatpush3.bf16.xpose.msra.mxu1 %v390_v40  ;;  %v720_v5 = vsel %vm382_vm4, %v680_v61, 0  ;;  %v686_v21 = vrot.slane %v1877_v8, 2  ;;  %v685_v24 = vrot.slane %v1880_v13, 1  ;;  %v1897_v26 = vsel %vm511_vm5, %v512_v16, %v513_v17 }
  0x2d   : > { %1463 = vmatpush3.bf16.xpose.msra.mxu0 %v714_v41  ;;  %1384 = vmatprep.subr.bf16.mxu1 %v1687_v1  ;;  %v684_v23 = vsel %vm661_vm3, %v679_v56, %v683_v12  ;;  %v399_v27 = vsel %vm382_vm4, %v357_v20, 0  ;;  %v360_v29 = vor.u32 %v1842_v46, %v356_v7  ;;  %v364_v30 = vrot.slane %v1858_v57, 1  ;;  %v265_v56 = vld [vmem:[%s1777_s14 + $0x4c] sm:$0xf] }
  0x2e   : > { %1464 = vmatprep.subr.bf16.mxu0 %v1687_v1  ;;  %v723_v28 = vsel %vm382_vm4, %v684_v23, 0  ;;  %v687_v32 = vor.u32 %v686_v21, %v685_v24  ;;  %v690_v33 = vshrl.u32 %v1892_v25, 16  ;;  %v693_v35 = vshll.u32 %v1892_v25, 16 }
  0x2f   : > { %v365_v37 = vsel %vm313_vm2, %v360_v29, %v364_v30  ;;  %v1914_v42 = vcombine.low %v264_v36, %v264_v36  ;;  %v368_v47 = vor.u32 %v1861_v58, %v364_v30  ;;  %v372_v48 = vrot.slane %v1877_v8, 1 }
  0x30   : > { %v688_v38 = vsel %vm661_vm3, %v683_v12, %v687_v32  ;;  %v692_v40 = vrot.slane %v690_v33, 1  ;;  %v695_v41 = vrot.slane %v693_v35, 2  ;;  %v402_v43 = vsel %vm382_vm4, %v365_v37, 0 }
  0x31   : > { %v726_v44 = vsel %vm382_vm4, %v688_v38, 0  ;;  %v1920_v49 = vcombine.low %v262_v14, %v262_v14  ;;  %v373_v54 = vsel %vm313_vm2, %v368_v47, %v372_v48  ;;  %v1930_v63 = vcombine.low %v264_v36, %v265_v56  ;;  %v1266_v38 = vld [vmem:[%s2258_s1 + $0x4] sm:$0xf] }
  0x32   : > { %v696_v50 = vor.u32 %v695_v41, %v692_v40  ;;  %v376_v12 = vor.u32 %v1880_v13, %v372_v48  ;;  %v928_v30 = vrot.slane %v1796_v10, 2  ;;  %v931_v36 = vrot.slane %v1810_v22, 2  ;;  %v1284_v41 = vld [vmem:[%s2258_s1 + $0x10] sm:$0xf] }
  0x33   : > { %v378_v55 = vshll.u32 %v1920_v49, 16  ;;  %v871_v6 = vrot.slane %v1930_v63, 2  ;;  %v932_v37 = vrot.slane %v1804_v18, 3  ;;  %v453_v40 = vsel %vm382_vm4, %v1780_v2, 0 }
  0x34   : > { %1385 = vmatpush3.bf16.xpose.msra.mxu1 %v393_v52  ;;  %v699_v52 = vshrl.u32 %v1914_v42, 16  ;;  %v697_v59 = vsel %vm661_vm3, %v687_v32, %v696_v50  ;;  %v929_v32 = vrot.slane %v1793_v9, 3  ;;  %v781_v10 = vrot.slane %v1799_v11, 2 }
  0x35   : > { %1465 = vmatpush3.bf16.xpose.msra.mxu0 %v717_v53  ;;  %1386 = vmatprep.subr.bf16.mxu1 %v1687_v1  ;;  %v702_v53 = vshll.u32 %v1914_v42, 16  ;;  %v729_v7 = vsel %vm382_vm4, %v697_v59, 0  ;;  %v380_v14 = vrot.slane %v378_v55, 1  ;;  %v455_v22 = vsel %vm382_vm4, %v1783_v3, 0 }
  0x36   : > { %1466 = vmatprep.subr.bf16.mxu0 %v1687_v1  ;;  %v701_v61 = vrot.slane %v699_v52, 1  ;;  %v783_v48 = vrot.slane %v1807_v19, 2  ;;  %v457_v52 = vsel %vm382_vm4, %v1786_v4, 0  ;;  %v459_v56 = vsel %vm382_vm4, %v1799_v11, 0 }
  0x37   : > { %v704_v62 = vrot.slane %v702_v53, 2  ;;  %v381_v20 = vsel %vm313_vm2, %v376_v12, %v380_v14  ;;  %v789_v12 = vrot.slane %v1867_v60, 2 }
  0x38   : > { %v408_v23 = vsel %vm382_vm4, %v381_v20, 0 }
  0x39   : > { %v705_v15 = vor.u32 %v704_v62, %v701_v61  ;;  %v787_v61 = vrot.slane %v1851_v51, 2 }
  0x3b   : > { %v706_v21 = vsel %vm661_vm3, %v696_v50, %v705_v15  ;;  %v784_v50 = vsel %vm777_vm6, %v781_v10, %v783_v48  ;;  %v790_v14 = vsel %vm777_vm6, %v787_v61, %v789_v12  ;;  %v463_v15 = vsel %vm382_vm4, %v1832_v39, 0 }
  0x3c   : > { %1387 = vmatpush3.bf16.xpose.msra.mxu1 %v396_v0  ;;  %v405_v0 = vsel %vm382_vm4, %v373_v54, 0  ;;  %v732_v24 = vsel %vm382_vm4, %v706_v21, 0  ;;  %v805_v53 = vsel %vm382_vm4, %v784_v50, 0  ;;  %v785_v54 = vrot.slane %v1832_v39, 2 }
  0x3d   : > { %1467 = vmatpush3.bf16.xpose.msra.mxu0 %v720_v5  ;;  %1388 = vmatprep.subr.bf16.mxu1 %v1687_v1  ;;  %v1934_v5 = vrot.slane %v1892_v25, 2  ;;  %v814_v20 = vsel %vm382_vm4, %v790_v14, 0  ;;  %v1278_v14 = vld [vmem:[%s2258_s1 + $0x8] sm:$0xf] }
  0x3e   : > { %1468 = vmatprep.subr.bf16.mxu0 %v1687_v1  ;;  %v786_v55 = vsel %vm777_vm6, %v783_v48, %v785_v54  ;;  %v788_v62 = vsel %vm777_vm6, %v785_v54, %v787_v61  ;;  %v2094_v54 = vld [vmem:[%s1777_s14 + $0x50] ss:$0 sps:$4 sm:$0xff]  }
  0x3f   : > { %v1943_v16 = vsel %vm777_vm6, %v1934_v5, %v871_v6  ;;  %v808_v59 = vsel %vm382_vm4, %v786_v55, 0  ;;  %v792_v21 = vsel %vm777_vm6, %v789_v12, %v1934_v5  ;;  %v873_v61 = vrot.slane %v2094_v54, 2 }
  0x40   : > { %v936_v12 = vrot.slane %v1819_v31, 3 }
  0x44   : > { %1389 = vmatpush3.bf16.xpose.msra.mxu1 %v399_v27  ;;  %v778_v27 = vrot.slane %v1783_v3, 2 }
  0x45   : > { %1469 = vmatpush3.bf16.xpose.msra.mxu0 %v723_v28  ;;  %1390 = vmatprep.subr.bf16.mxu1 %v1687_v1  ;;  %v779_v28 = vrot.slane %v1786_v4, 2 }
  0x46   : > { %1470 = vmatprep.subr.bf16.mxu0 %v1687_v1 }
  0x47   : > { %v780_v29 = vsel %vm777_vm6, %v778_v27, %v779_v28  ;;  %v782_v2 = vsel %vm777_vm6, %v779_v28, %v781_v10  ;;  %v793_v27 = vrot.slane %v1914_v42, 2  ;;  %v521_v10 = vrot.slane %v1832_v39, 1 }
  0x48   : > { %v799_v9 = vsel %vm382_vm4, %v780_v29, 0  ;;  %v802_v47 = vsel %vm382_vm4, %v782_v2, 0  ;;  %v467_v29 = vsel %vm382_vm4, %v1867_v60, 0 }
  0x49   : > { %v794_v28 = vsel %vm777_vm6, %v1934_v5, %v793_v27  ;;  %v1286_v5 = vld [vmem:[%s2258_s1 + $0x14] sm:$0xf] }
  0x4c   : > { %1391 = vmatpush3.bf16.xpose.msra.mxu1 %v402_v43  ;;  %v930_v43 = vor.u32 %v929_v32, %v928_v30  ;;  %v820_v30 = vsel %vm382_vm4, %v794_v28, 0  ;;  %v267_v32 = vld [vmem:[%s2258_s1] sm:$0xf] }
  0x4d   : > { %1471 = vmatpush3.bf16.xpose.msra.mxu0 %v726_v44  ;;  %1392 = vmatprep.subr.bf16.mxu1 %v1687_v1  ;;  %v1968_v44 = vor.u32 %v932_v37, %v931_v36  ;;  %v533_v36 = vsel %vm382_vm4, %v1897_v26, 0  ;;  %v515_v37 = vrot.slane %v1786_v4, 1 }
  0x4e   : > { %1472 = vmatprep.subr.bf16.mxu0 %v1687_v1 }
  0x4f   : > { %v1975_v18 = vsel %vm927_vm7, %v930_v43, %v1968_v44  ;;  %v516_v26 = vsel %vm511_vm5, %v513_v17, %v515_v37 }
  0x54   : > { %1393 = vmatpush3.bf16.xpose.msra.mxu1 %v405_v0  ;;  %v461_v0 = vsel %vm382_vm4, %v1807_v19, 0 }
  0x55   : > { %1473 = vmatpush3.bf16.xpose.msra.mxu0 %v729_v7  ;;  %1394 = vmatprep.subr.bf16.mxu1 %v1687_v1  ;;  %v811_v7 = vsel %vm382_vm4, %v788_v62, 0 }
  0x56   : > { %1474 = vmatprep.subr.bf16.mxu0 %v1687_v1 }
  0x5c   : > { %1395 = vmatpush3.bf16.xpose.msra.mxu1 %v408_v23  ;;  %v465_v23 = vsel %vm382_vm4, %v1851_v51, 0 }
  0x5d   : > { %1475 = vmatpush3.bf16.xpose.msra.mxu0 %v732_v24  ;;  %1400 = vmatprep.subr.bf16.mxu1 %v1687_v1  ;;  %v817_v24 = vsel %vm382_vm4, %v792_v21, 0 }
  0x5e   : > { %1480 = vmatprep.subr.bf16.mxu0 %v1687_v1 }
  0x63   : > { %1397 = vmatmul.mubr.msk.bf16.vlgmr.msra.gmra.mrb[0].mxu1 %vm382_vm4, %v1266_v38  ;;  %v536_v38 = vsel %vm382_vm4, %v516_v26, 0  ;;  %v959_v26 = vshll.u32 %v1930_v63, 16 }
  0x64   : > { %1401 = vmatpush3.bf16.xpose.msra.mxu1 %v453_v40  ;;  %1477 = vmatmul.mubr.msk.bf16.vlgmr.msra.gmra.mrb[0].mxu0 %vm382_vm4, %v1284_v41  ;;  %v517_v40 = vrot.slane %v1799_v11, 1  ;;  %v519_v41 = vrot.slane %v1807_v19, 1 }
  0x65   : > { %1481 = vmatpush3.bf16.xpose.msra.mxu0 %v799_v9  ;;  %1402 = vmatprep.subr.bf16.mxu1 %v1687_v1 }
  0x66   : > { %1482 = vmatprep.subr.bf16.mxu0 %v1687_v1  ;;  %1416 = vmatprep.mubr.msk.bf16.mxu1 %vm1688_vm1, %v1687_v1  ;;  %v518_v3 = vsel %vm511_vm5, %v515_v37, %v517_v40  ;;  %v520_v43 = vsel %vm511_vm5, %v517_v40, %v519_v41  ;;  %v522_v2 = vsel %vm511_vm5, %v519_v41, %v521_v10  ;;  %v956_v37 = vshrl.u32 %v1930_v63, 16 }
  0x67   : > { %1496 = vmatprep.mubr.msk.bf16.mxu0 %vm1688_vm1, %v1687_v1  ;;  %v2059_v17 = vsel %vm382_vm4, %v518_v3, 0  ;;  %v2067_v9 = vsel %vm382_vm4, %v520_v43, 0  ;;  %v961_v40 = vrot.slane %v959_v26, 3  ;;  %v605_v3 = vrot.slane %v1892_v25, 1  ;;  %v1143_v26 = vld [vmem:[%s1765_s10] sm:$0xff] }
  0x68   : > { %v965_v41 = vshrl.u32 %v2094_v54, 16  ;;  %v968_v43 = vshll.u32 %v2094_v54, 16 }
  0x6c   : > { %1403 = vmatpush3.bf16.xpose.msra.mxu1 %v455_v22  ;;  %v2075_v22 = vsel %vm382_vm4, %v522_v2, 0  ;;  %v967_v2 = vrot.slane %v965_v41, 2 }
  0x6d   : > { %1483 = vmatpush3.bf16.xpose.msra.mxu0 %v802_v47  ;;  %1404 = vmatprep.subr.bf16.mxu1 %v1687_v1 }
  0x6e   : > { %1484 = vmatprep.subr.bf16.mxu0 %v1687_v1 }
  0x74   : > { %1405 = vmatpush3.bf16.xpose.msra.mxu1 %v457_v52  ;;  %v2086_v52 = vrot.slane %v1867_v60, 1 }
  0x75   : > { %1485 = vmatpush3.bf16.xpose.msra.mxu0 %v805_v53  ;;  %1406 = vmatprep.subr.bf16.mxu1 %v1687_v1 }
  0x76   : > { %1486 = vmatprep.subr.bf16.mxu0 %v1687_v1 }
  0x7c   : > { %1407 = vmatpush3.bf16.xpose.msra.mxu1 %v459_v56  ;;  %v879_v56 = vsel %vm382_vm4, %v1943_v16, 0 }
  0x7d   : > { %1487 = vmatpush3.bf16.xpose.msra.mxu0 %v808_v59  ;;  %1408 = vmatprep.subr.bf16.mxu1 %v1687_v1 }
  0x7e   : > { %1488 = vmatprep.subr.bf16.mxu0 %v1687_v1 }
  0x84   : > { %1409 = vmatpush3.bf16.xpose.msra.mxu1 %v461_v0  ;;  %v874_v0 = vsel %vm777_vm6, %v871_v6, %v873_v61  ;;  %v1288_v6 = vld [vmem:[%s2258_s1 + $0x18] sm:$0xf]  ;;  %v1044_v61 = vrot.slane %v1786_v4, 3  ;;  %v1047_v4 = vrot.slane %v1807_v19, 3 }
  0x85   : > { %1489 = vmatpush3.bf16.xpose.msra.mxu0 %v811_v7  ;;  %1410 = vmatprep.subr.bf16.mxu1 %v1687_v1 }
  0x86   : > { %1490 = vmatprep.subr.bf16.mxu0 %v1687_v1 }
  0x8c   : > { %1411 = vmatpush3.bf16.xpose.msra.mxu1 %v463_v15  ;;  %v977_v15 = vsel %vm382_vm4, %v1975_v18, 0  ;;  %v940_v18 = vrot.slane %v1839_v45, 3 }
  0x8d   : > { %1491 = vmatpush3.bf16.xpose.msra.mxu0 %v814_v20  ;;  %1412 = vmatprep.subr.bf16.mxu1 %v1687_v1 }
  0x8e   : > { %1492 = vmatprep.subr.bf16.mxu0 %v1687_v1 }
  0x94   : > { %1413 = vmatpush3.bf16.xpose.msra.mxu1 %v465_v23 }
  0x95   : > { %1493 = vmatpush3.bf16.xpose.msra.mxu0 %v817_v24  ;;  %1414 = vmatprep.subr.bf16.mxu1 %v1687_v1 }
  0x96   : > { %1494 = vmatprep.subr.bf16.mxu0 %v1687_v1 }
  0x9c   : > { %1415 = vmatpush3.bf16.xpose.msra.mxu1 %v467_v29  ;;  %v947_v29 = vrot.slane %v1880_v13, 2  ;;  %v952_v13 = vrot.slane %v693_v35, 3 }
  0x9d   : > { %1495 = vmatpush3.bf16.xpose.msra.mxu0 %v820_v30  ;;  %1420 = vmatprep.subr.bf16.mxu1 %v1687_v1  ;;  %v948_v30 = vrot.slane %v1877_v8, 3 }
  0x9e   : > { %1500 = vmatprep.subr.bf16.mxu0 %v1687_v1 }
  0xa3   : > { %1417 = vmatmul.mubr.msk.bf16.vlgmr.msra.gmra.mrb[0].mxu1 %vm382_vm4, %v267_v32  ;;  %v949_v32 = vor.u32 %v948_v30, %v947_v29 }
  0xa4   : > { %1421 = vmatpush3.bf16.xpose.msra.mxu1 %v533_v36  ;;  %1497 = vmatmul.mubr.msk.bf16.vlgmr.msra.gmra.mrb[0].mxu0 %vm382_vm4, %v1286_v5  ;;  %v951_v36 = vrot.slane %v690_v33, 2  ;;  %v958_v33 = vrot.slane %v956_v37, 2 }
  0xa5   : > { %1501 = vmatpush3.bf16.xpose.msra.mxu0 %v802_v47  ;;  %1422 = vmatprep.subr.bf16.mxu1 %v1687_v1  ;;  %v523_v47 = vrot.slane %v1851_v51, 1 }
  0xa6   : > { %1502 = vmatprep.subr.bf16.mxu0 %v1687_v1  ;;  %1436 = vmatprep.mubr.msk.bf16.mxu1 %vm1688_vm1, %v1687_v1  ;;  %v953_v5 = vor.u32 %v952_v13, %v951_v36 }
  0xa7   : > { %1516 = vmatprep.mubr.msk.bf16.mxu0 %vm1688_vm1, %v1687_v1  ;;  %v524_v48 = vsel %vm511_vm5, %v521_v10, %v523_v47 }
  0xa8   : > { %v2083_v50 = vsel %vm382_vm4, %v524_v48, 0 }
  0xac   : > { %1423 = vmatpush3.bf16.xpose.msra.mxu1 %v536_v38 }
  0xad   : > { %1503 = vmatpush3.bf16.xpose.msra.mxu0 %v805_v53  ;;  %1424 = vmatprep.subr.bf16.mxu1 %v1687_v1  ;;  %v526_v53 = vsel %vm511_vm5, %v523_v47, %v2086_v52 }
  0xae   : > { %1504 = vmatprep.subr.bf16.mxu0 %v1687_v1  ;;  %v2097_v55 = vsel %vm382_vm4, %v526_v53, 0 }
  0xb4   : > { %1425 = vmatpush3.bf16.xpose.msra.mxu1 %v2059_v17 }
  0xb5   : > { %1505 = vmatpush3.bf16.xpose.msra.mxu0 %v808_v59  ;;  %1426 = vmatprep.subr.bf16.mxu1 %v1687_v1  ;;  %v527_v59 = vrot.slane %v1920_v49, 1  ;;  %v882_v49 = vsel %vm382_vm4, %v874_v0, 0  ;;  %v1280_v0 = vld [vmem:[%s2258_s1 + $0xc] sm:$0xf] }
  0xb6   : > { %1506 = vmatprep.subr.bf16.mxu0 %v1687_v1 }
  0xb7   : > { %v528_v62 = vsel %vm511_vm5, %v2086_v52, %v527_v59 }
  0xb8   : > { %v554_v16 = vsel %vm382_vm4, %v528_v62, 0  ;;  %v1045_v62 = vrot.slane %v1799_v11, 3 }
  0xba   : > { %v1048_v11 = vsel %vm1043_vm8, %v1045_v62, %v1047_v4 }
  0xbc   : > { %1427 = vmatpush3.bf16.xpose.msra.mxu1 %v2067_v9 }
  0xbd   : > { %1507 = vmatpush3.bf16.xpose.msra.mxu0 %v811_v7  ;;  %1428 = vmatprep.subr.bf16.mxu1 %v1687_v1  ;;  %v935_v7 = vrot.slane %v1823_v34, 2  ;;  %v939_v34 = vrot.slane %v1842_v46, 2  ;;  %v944_v46 = vrot.slane %v1858_v57, 3 }
  0xbe   : > { %1508 = vmatprep.subr.bf16.mxu0 %v1687_v1 }
  0xbf   : > { %v941_v23 = vor.u32 %v940_v18, %v939_v34  ;;  %v1055_v18 = vrot.slane %v1892_v25, 3 }
  0xc4   : > { %1429 = vmatpush3.bf16.xpose.msra.mxu1 %v2075_v22 }
  0xc5   : > { %1509 = vmatpush3.bf16.xpose.msra.mxu0 %v814_v20  ;;  %1430 = vmatprep.subr.bf16.mxu1 %v1687_v1  ;;  %v937_v20 = vor.u32 %v936_v12, %v935_v7  ;;  %v1068_v7 = vsel %vm382_vm4, %v1048_v11, 0  ;;  %v1049_v12 = vrot.slane %v1832_v39, 3 }
  0xc6   : > { %1510 = vmatprep.subr.bf16.mxu0 %v1687_v1 }
  0xc7   : > { %v938_v31 = vsel %vm927_vm7, %v1968_v44, %v937_v20  ;;  %v943_v44 = vrot.slane %v1861_v58, 2 }
  0xc8   : > { %v980_v21 = vsel %vm382_vm4, %v938_v31, 0  ;;  %v1053_v31 = vrot.slane %v1867_v60, 3 }
  0xc9   : > { %v945_v27 = vor.u32 %v944_v46, %v943_v44  ;;  %v1059_v44 = vrot.slane %v2094_v54, 3 }
  0xcb   : > { %v946_v28 = vsel %vm927_vm7, %v941_v23, %v945_v27  ;;  %v950_v57 = vsel %vm927_vm7, %v945_v27, %v949_v32 }
  0xcc   : > { %1431 = vmatpush3.bf16.xpose.msra.mxu1 %v2083_v50  ;;  %v986_v58 = vsel %vm382_vm4, %v946_v28, 0  ;;  %v989_v8 = vsel %vm382_vm4, %v950_v57, 0 }
  0xcd   : > { %1511 = vmatpush3.bf16.xpose.msra.mxu0 %v817_v24  ;;  %1432 = vmatprep.subr.bf16.mxu1 %v1687_v1  ;;  %v942_v24 = vsel %vm927_vm7, %v937_v20, %v941_v23  ;;  %v1057_v23 = vrot.slane %v1930_v63, 3  ;;  %v1294_v63 = vld [vmem:[%s2258_s1 + $0x20] sm:$0xf] }
  0xce   : > { %1512 = vmatprep.subr.bf16.mxu0 %v1687_v1  ;;  %v983_v45 = vsel %vm382_vm4, %v942_v24, 0 }
  0xcf   : > { %v1058_v60 = vsel %vm1043_vm8, %v1055_v18, %v1057_v23  ;;  %v1060_v25 = vsel %vm1043_vm8, %v1057_v23, %v1059_v44 }
  0xd0   : > { %v1083_v24 = vsel %vm382_vm4, %v1058_v60, 0  ;;  %v1086_v46 = vsel %vm382_vm4, %v1060_v25, 0 }
  0xd4   : > { %1433 = vmatpush3.bf16.xpose.msra.mxu1 %v2097_v55 }
  0xd5   : > { %1513 = vmatpush3.bf16.xpose.msra.mxu0 %v879_v56  ;;  %1434 = vmatprep.subr.bf16.mxu1 %v1687_v1 }
  0xd6   : > { %1514 = vmatprep.subr.bf16.mxu0 %v1687_v1 }
  0xdc   : > { %1435 = vmatpush3.bf16.xpose.msra.mxu1 %v554_v16  ;;  %v1292_v16 = vld [vmem:[%s2258_s1 + $0x1c] sm:$0xf] }
  0xdd   : > { %1515 = vmatpush3.bf16.xpose.msra.mxu0 %v882_v49  ;;  %1440 = vmatprep.subr.bf16.mxu1 %v1687_v1 }
  0xde   : > { %1520 = vmatprep.subr.bf16.mxu0 %v1687_v1 }
  0xe3   : > { %1437 = vmatmul.mubr.msk.bf16.vlgmr.msra.gmra.mrb[0].mxu1 %vm382_vm4, %v1278_v14  ;;  %v1050_v14 = vsel %vm1043_vm8, %v1047_v4, %v1049_v12 }
  0xe4   : > { %1441 = vmatpush3.bf16.xpose.msra.mxu1 %v536_v38  ;;  %1517 = vmatmul.mubr.msk.bf16.vlgmr.msra.gmra.mrb[0].mxu0 %vm382_vm4, %v1288_v6  ;;  %v954_v38 = vsel %vm927_vm7, %v949_v32, %v953_v5  ;;  %v1071_v19 = vsel %vm382_vm4, %v1050_v14, 0  ;;  %v1051_v6 = vrot.slane %v1851_v51, 3  ;;  %v1056_v51 = vsel %vm1043_vm8, %v1053_v31, %v1055_v18 }
  0xe5   : > { %1521 = vmatpush3.bf16.xpose.msra.mxu0 %v977_v15  ;;  %1442 = vmatprep.subr.bf16.mxu1 %v1687_v1  ;;  %v992_v35 = vsel %vm382_vm4, %v954_v38, 0 }
  0xe6   : > { %1522 = vmatprep.subr.bf16.mxu0 %v1687_v1  ;;  %1456 = vmatprep.mubr.msk.bf16.mxu1 %vm1688_vm1, %v1687_v1  ;;  %v1052_v15 = vsel %vm1043_vm8, %v1049_v12, %v1051_v6  ;;  %v1054_v39 = vsel %vm1043_vm8, %v1051_v6, %v1053_v31 }
  0xe7   : > { %1536 = vmatprep.mubr.msk.bf16.mxu0 %vm1688_vm1, %v1687_v1  ;;  %v1074_v20 = vsel %vm382_vm4, %v1052_v15, 0  ;;  %v1077_v34 = vsel %vm382_vm4, %v1054_v39, 0 }
  0xec   : > { %1443 = vmatpush3.bf16.xpose.msra.mxu1 %v2059_v17  ;;  %v962_v17 = vor.u32 %v961_v40, %v958_v33 }
  0xed   : > { %1523 = vmatpush3.bf16.xpose.msra.mxu0 %v980_v21  ;;  %1444 = vmatprep.subr.bf16.mxu1 %v1687_v1  ;;  %v1080_v21 = vsel %vm382_vm4, %v1056_v51, 0 }
  0xee   : > { %1524 = vmatprep.subr.bf16.mxu0 %v1687_v1  ;;  %v963_v10 = vsel %vm927_vm7, %v953_v5, %v962_v17 }
  0xef   : > { %v995_v48 = vsel %vm382_vm4, %v963_v10, 0 }
  0xf4   : > { %1445 = vmatpush3.bf16.xpose.msra.mxu1 %v2067_v9  ;;  %v606_v9 = vsel %vm511_vm5, %v2086_v52, %v605_v3 }
  0xf5   : > { %1525 = vmatpush3.bf16.xpose.msra.mxu0 %v983_v45  ;;  %1446 = vmatprep.subr.bf16.mxu1 %v1687_v1  ;;  %v613_v47 = vsel %vm382_vm4, %v606_v9, 0 }
  0xf6   : > { %1526 = vmatprep.subr.bf16.mxu0 %v1687_v1 }
  0xfc   : > { %1447 = vmatpush3.bf16.xpose.msra.mxu1 %v2075_v22  ;;  %v970_v22 = vrot.slane %v968_v43, 3 }
  0xfd   : > { %1527 = vmatpush3.bf16.xpose.msra.mxu0 %v986_v58  ;;  %1448 = vmatprep.subr.bf16.mxu1 %v1687_v1 }
  0xfe   : > { %1528 = vmatprep.subr.bf16.mxu0 %v1687_v1  ;;  %v971_v53 = vor.u32 %v970_v22, %v967_v2 }
 0x100   : > { %v972_v52 = vsel %vm927_vm7, %v962_v17, %v971_v53 }
 0x101   : > { %v998_v59 = vsel %vm382_vm4, %v972_v52, 0 }
 0x104   : > { %1449 = vmatpush3.bf16.xpose.msra.mxu1 %v2083_v50  ;;  %v607_v50 = vrot.slane %v1914_v42, 1  ;;  %v1046_v42 = vsel %vm1043_vm8, %v1044_v61, %v1045_v62 }
 0x105   : > { %1529 = vmatpush3.bf16.xpose.msra.mxu0 %v989_v8  ;;  %1450 = vmatprep.subr.bf16.mxu1 %v1687_v1  ;;  %v1065_v49 = vsel %vm382_vm4, %v1046_v42, 0  ;;  %v1137_v8 = vld [vmem:[%s1757_s30] sm:$0xff] }
 0x106   : > { %1530 = vmatprep.subr.bf16.mxu0 %v1687_v1 }
 0x10c   : > { %1451 = vmatpush3.bf16.xpose.msra.mxu1 %v2097_v55  ;;  %v608_v55 = vsel %vm511_vm5, %v605_v3, %v607_v50 }
 0x10d   : > { %1531 = vmatpush3.bf16.xpose.msra.mxu0 %v992_v35  ;;  %1452 = vmatprep.subr.bf16.mxu1 %v1687_v1  ;;  %v616_v56 = vsel %vm382_vm4, %v608_v55, 0 }
 0x10e   : > { %1532 = vmatprep.subr.bf16.mxu0 %v1687_v1 }
 0x114   : > { %1453 = vmatpush3.bf16.xpose.msra.mxu1 %v613_v47 }
 0x115   : > { %1533 = vmatpush3.bf16.xpose.msra.mxu0 %v995_v48  ;;  %1454 = vmatprep.subr.bf16.mxu1 %v1687_v1 }
 0x116   : > { %1534 = vmatprep.subr.bf16.mxu0 %v1687_v1 }
 0x11c   : > { %1455 = vmatpush3.bf16.xpose.msra.mxu1 %v616_v56 }
 0x11d   : > { %1535 = vmatpush3.bf16.xpose.msra.mxu0 %v998_v59 }
 0x11e   : > { %1540 = vmatprep.subr.bf16.mxu0 %v1687_v1 }
 0x123   : > { %1457 = vmatmul.mubr.msk.bf16.vlgmr.msra.gmra.mrb[0].mxu1 %vm382_vm4, %v1280_v0 }
 0x124   : > { %1537 = vmatmul.mubr.msk.bf16.vlgmr.msra.gmra.mrb[0].mxu0 %vm382_vm4, %v1292_v16 }
 0x125   : > { %1541 = vmatpush3.bf16.xpose.msra.mxu0 %v1065_v49  ;;  %1556 = vmatprep.mubr.msk.bf16.mxu0 %vm1688_vm1, %v1687_v1 }
 0x126   : > { %1542 = vmatprep.subr.bf16.mxu0 %v1687_v1 }
 0x12d   : > { %1543 = vmatpush3.bf16.xpose.msra.mxu0 %v1068_v7 }
 0x12e   : > { %1544 = vmatprep.subr.bf16.mxu0 %v1687_v1 }
 0x135   : > { %1545 = vmatpush3.bf16.xpose.msra.mxu0 %v1071_v19 }
 0x136   : > { %1546 = vmatprep.subr.bf16.mxu0 %v1687_v1 }
 0x13d   : > { %1547 = vmatpush3.bf16.xpose.msra.mxu0 %v1074_v20 }
 0x13e   : > { %1548 = vmatprep.subr.bf16.mxu0 %v1687_v1 }
 0x145   : > { %1549 = vmatpush3.bf16.xpose.msra.mxu0 %v1077_v34 }
 0x146   : > { %1550 = vmatprep.subr.bf16.mxu0 %v1687_v1 }
 0x14d   : > { %1551 = vmatpush3.bf16.xpose.msra.mxu0 %v1080_v21 }
 0x14e   : > { %1552 = vmatprep.subr.bf16.mxu0 %v1687_v1 }
 0x155   : > { %1553 = vmatpush3.bf16.xpose.msra.mxu0 %v1083_v24 }
 0x156   : > { %1554 = vmatprep.subr.bf16.mxu0 %v1687_v1  ;;  %v1296_v1 = vld [vmem:[%s224_s27] ss:$0 sm:$0xff] }
 0x15d   : > { %1555 = vmatpush3.bf16.xpose.msra.mxu0 %v1086_v46 }
 0x164   : > { %1557 = vmatmul.mubr.msk.bf16.vlgmr.msra.gmra.mrb[0].mxu0 %vm382_vm4, %v1294_v63 }
 0x1f6   : > { %v652_v45 = vpop.f32.mrb[0].mxu1 }
 0x1f7   : > { %v1458_v27 = vpop.f32.mrb[1].mxu1 }
 0x1f8   : > { %v655_v28 = vpop.f32.mrb[2].mxu1 }
 0x1f9   : > { %v1459_v54 = vpop.f32.mrb[3].mxu1 }
 0x237   : > { %v1122_v29 = vpop.f32.mrb[0].mxu0 }
 0x238   : > { %v1560_v30 = vadd.f32 %v1122_v29, %v652_v45  ;;  %v1558_v58 = vpop.f32.mrb[1].mxu0 }
 0x239   : > { %v1125_v32 = vpop.f32.mrb[2].mxu0 }
 0x23a   : > { %v1559_v57 = vpop.f32.mrb[3].mxu0  ;;  %v1136_v36 = vmul.f32 %v1560_v30, %v1296_v1 }
 0x23c   : > { %1138 = vadd.xlane.f32.xlu0 %v1136_v36  ;;  %v1144_v13 = vmul.f32 %v1136_v36, %v1136_v36 }
 0x240   : > { %1145 = vadd.xlane.f32.xlu0 %v1144_v13 }
 0x2c9   : > { %v1139_v5 = vpop.xlane.xlu0 %1138 }
 0x2ca   : > { %v1140_v37 = vadd.f32 %v1139_v5, %v1137_v8 }
 0x2cc   : > { %1142 = vst.msk [vmem:[%s1757_s30] sm:$0xff] %vm1141_vm9, %v1140_v37 }
 0x2cd   : > { %v1146_v38 = vpop.xlane.xlu0 %1145 }
 0x2ce   : > { %v1147_v33 = vadd.f32 %v1146_v38, %v1143_v26 }
 0x2d0   : > { %1148 = vst.msk [vmem:[%s1765_s10] sm:$0xff] %vm1141_vm9, %v1147_v33 }
 0x2d1 PF: > { %s15_s19 = sadd.s32 1, %s1684_s19   ;;  %s2262_s15 = smov %s1676_s17 }
 0x2d2   : > { %p12_p8 = scmp.ge.s32.totalorder %s15_s19, 8   ;;  %s2263_s16 = smov %s1680_s18 }
 0x2d3   : > { %s2264_s17 = smov %s2267_s20  ;;  %s2265_s18 = smov %s2271_s21 }
 0x2d4   :  { %14 = sbr.rel (!%p12_p8) target bundleno = 3 (0x3), region = 90 }

</bundles_post_ra>
